<compile_context>
chip_gen: v7x
topology: tpu7x:2x2x1
jax: 0.10.0
libtpu: 0.0.40
codegen_flags: <defaults>
</compile_context>

<pallas_src>
import functools

import numpy as np
import jax
import jax.numpy as jnp
from jax import lax
from jax.experimental import pallas as pl
from jax.experimental.pallas import tpu as pltpu

SCALING = 1e-3  # SignalForwardModel(sequence='MEGRE').scaling


def _cmatmul_cat(ar, ai, bc, n):
    """(ar + i*ai) @ (br + i*bi) with bc = [br | bi] pre-concatenated on lanes (K, 2n).

    Two MXU dots of width 2n instead of Gauss's three of width n: while n <= 128 a
    2n-wide dot costs the same pass count on the 256-wide v6e/v7x MXU, so this is 2/3
    of the MXU work, drops the Gauss pre-adds/post-subtracts (VPU), and avoids the
    cancellation-prone p3-p1-p2 imaginary part.  bf16 operands, f32 accumulation.
    TODO(synk): fall back to the Gauss 3-multiply form once n >= 256 (>= 128 on v5e).
    """
    ar = ar.astype(jnp.bfloat16)
    ai = ai.astype(jnp.bfloat16)
    p = jnp.dot(ar, bc, preferred_element_type=jnp.float32)   # [ar@br | ar@bi]
    q = jnp.dot(ai, bc, preferred_element_type=jnp.float32)   # [ai@br | ai@bi]
    return p[:, :n] - q[:, n:], p[:, n:] + q[:, :n]


def dc_kernel(tes_ref, maps_ref, sre_ref, sim_ref, ykre_ref, ykim_ref, maskdcw_ref,
              fwc_ref, fhc_ref, ifhc_ref, ifwc_ref, out_ref):
    """One echo per grid step: MEGRE signal model -> sens_expand -> coil-batched fft2
    -> soft DC -> ifft2 -> sens_reduce.  All coils ride in one stacked matmul operand;
    conjugation and the 1/(H*W) 'backward' ifft normalization live in the precomputed
    inverse DFT operands; dc_weight is pre-folded into the mask."""
    C, H, W = sre_ref.shape
    e = pl.program_id(0)
    te = tes_ref[e]                                    # f32 scalar straight from SMEM

    r2 = maps_ref[0]
    s0 = maps_ref[1]
    b0 = maps_ref[2]
    phi = maps_ref[3]

    # MEGRE signal model
    ft = jnp.exp(-te * SCALING * r2)
    ct = jnp.cos(b0 * (SCALING * -te))
    st = jnp.sin(b0 * (SCALING * -te))
    s_re = s0 * ft * ct - phi * ft * st
    s_im = s0 * ft * st + phi * ft * ct
    s_re = jnp.where(jnp.isnan(s_re), 0.0, s_re)       # SignalForwardModel NaN clamp
    s_im = jnp.where(jnp.isnan(s_im), 0.0, s_im)

    sens_re = sre_ref[...]
    sens_im = sim_ref[...]

    # sens_expand: complex_mul(image, sens) for all coils at once
    m_re = s_re[None] * sens_re - s_im[None] * sens_im          # (C, H, W)
    m_im = s_re[None] * sens_im + s_im[None] * sens_re

    # fft along W, coils stacked on the M axis: (C*H, W) @ (W, 2W)
    t1_re, t1_im = _cmatmul_cat(m_re.reshape(C * H, W), m_im.reshape(C * H, W),
                                fwc_ref[...], W)
    # per-coil spatial transpose, then fft along H: (C*W, H) @ (H, 2H)
    # TODO(synk): at production H,W (>=128) contract the H axis with a coil-batched
    #             dot_general (and keep inter-stage tensors bf16) instead of
    #             materializing f32 swapaxes copies through the XLU.
    t1_re = jnp.swapaxes(t1_re.reshape(C, H, W), 1, 2).reshape(C * W, H)
    t1_im = jnp.swapaxes(t1_im.reshape(C, H, W), 1, 2).reshape(C * W, H)
    kt_re, kt_im = _cmatmul_cat(t1_re, t1_im, fhc_ref[...], H)  # k-space, (W, H) layout

    # soft data consistency: mask already carries dc_weight; kspace is pre-transposed
    mt = maskdcw_ref[...]                                       # (W, H)
    d_re = (kt_re.reshape(C, W, H) - ykre_ref[0].astype(jnp.float32)) * mt[None]
    d_im = (kt_im.reshape(C, W, H) - ykim_ref[0].astype(jnp.float32)) * mt[None]

    # ifft along H (conjugation folded into ifhc)
    u_re, u_im = _cmatmul_cat(d_re.reshape(C * W, H), d_im.reshape(C * W, H),
                              ifhc_ref[...], H)
    # transpose back and ifft along W (conjugation + 1/(H*W) folded into ifwc)
    u_re = jnp.swapaxes(u_re.reshape(C, W, H), 1, 2).reshape(C * H, W)
    u_im = jnp.swapaxes(u_im.reshape(C, W, H), 1, 2).reshape(C * H, W)
    v_re, v_im = _cmatmul_cat(u_re, u_im, ifwc_ref[...], W)
    v_re = v_re.reshape(C, H, W)
    v_im = v_im.reshape(C, H, W)

    # sens_reduce: complex_mul(img, conj(sens)) summed over coils
    # TODO(synk): at production C,H,W add a coil-chunk grid axis with a VMEM f32
    #             accumulator (pl.when init / finalize) so the live set fits v7x VMEM.
    out_ref[0, 0] = jnp.sum(v_re * sens_re + v_im * sens_im, axis=0)
    out_ref[1, 0] = jnp.sum(v_im * sens_re - v_re * sens_im, axis=0)


def model_finalize_kernel(x_ref, pred_ref, w1_ref, b1_ref, w2_ref, b2_ref, out_ref,
                          *, img_h, img_w):
    """Regularizer (Conv3x3 -> ReLU -> Conv1x1) fused with the qVarNet epilogue.

    The 3x3 conv runs on flattened lane-dense activations (channels on sublanes, H*W on
    lanes): the 9 taps are static lane shifts of the zero-padded row (masked at the
    horizontal borders) and are stacked along K into one (9*cin, HW) bf16 operand, so
    the whole conv is a single MXU matmul with K = 9*cin instead of 9 skinny dots.
    """
    cin, HW = x_ref.shape
    hid = b1_ref.shape[0]
    n_maps = out_ref.shape[0]
    H, W = img_h, img_w

    x = x_ref[...]                                            # (2E, H*W) f32
    zpad = jnp.zeros((cin, W + 1), jnp.float32)
    xp = jnp.concatenate([zpad, x, zpad], axis=1)             # vertical taps read zeros
    col = lax.broadcasted_iota(jnp.int32, (1, HW), 1) % W     # x-coordinate of each lane

    taps = []
    for t in range(9):                                        # 9 static taps, tap-major K
        dy, dx = t // 3, t % 3
        start = (W + 1) + (dy - 1) * W + (dx - 1)
        xs = xp[:, start:start + HW]                          # shifted neighbourhood
        if dx == 0:                                           # left tap: mask x == 0
            xs = jnp.where(col >= 1, xs, 0.0)
        elif dx == 2:                                         # right tap: mask x == W-1
            xs = jnp.where(col < W - 1, xs, 0.0)
        taps.append(xs.astype(jnp.bfloat16))
    xs_all = jnp.concatenate(taps, axis=0)                    # (9*cin, HW) bf16

    h1 = jnp.dot(w1_ref[...], xs_all, preferred_element_type=jnp.float32) + b1_ref[...]
    h1 = jnp.maximum(h1, 0.0)                                 # ReLU, (hid, HW) f32
    y = jnp.dot(w2_ref[...], h1.astype(jnp.bfloat16),
                preferred_element_type=jnp.float32) + b2_ref[...]

    # epilogue: prediction + complex(model out); clamp map 0 (re & im) at 0; magnitude
    re = pred_ref[...] + y[:n_maps]
    im = y[n_maps:]
    row = lax.broadcasted_iota(jnp.int32, (n_maps, HW), 0)
    re = jnp.where(row == 0, jnp.maximum(re, 0.0), re)
    im = jnp.where(row == 0, jnp.maximum(im, 0.0), im)
    out_ref[...] = jnp.sqrt(re * re + im * im)


def _dft_matrices_np(n):
    """Non-centered DFT matrix (symmetric: F^T == F) as f32 numpy re/im planes."""
    k = np.arange(n)
    ang = -2.0 * np.pi * np.outer(k, k) / n
    return np.cos(ang).astype(np.float32), np.sin(ang).astype(np.float32)


def _dc_vmem_limit_bytes(C, H, W):
    """Double-buffered per-step blocks + in-flight intermediates, clamped to 48 MiB so
    we never request v7x's entire 64 MiB physical per-TC VMEM (128 MiB on v5e/v6e)."""
    blocks = (4 * H * W * 4                      # quantitative maps
              + 2 * C * H * W * 4                # sens re/im
              + 2 * C * W * H * 2                # per-echo kspace re/im (bf16)
              + W * H * 4                        # mask * dc_weight
              + 2 * (W * 2 * W + H * 2 * H) * 2  # fwd + inv DFT operands (bf16)
              + 2 * H * W * 4)                   # output block
    live = 12 * C * H * W * 4                    # worst-case live f32 complex planes
    return int(min(max(2 * blocks + live + (4 << 20), 16 << 20), 48 << 20))


def _finalize_vmem_limit_bytes(cin, hid, n_maps, HW):
    blocks = (cin * HW * 4 + n_maps * HW * 4 + hid * 9 * cin * 2 + hid * 4
              + 2 * n_maps * hid * 2 + 2 * n_maps * 4 + n_maps * HW * 4)
    live = (11 * cin + 2 * hid + 4 * n_maps) * HW * 4
    return int(min(max(2 * blocks + live + (4 << 20), 16 << 20), 48 << 20))


def qvarnet_block_forward(prediction, masked_kspace, sensitivity_maps,
                          sampling_mask, tes, params):
    """prediction [1,4,H,W] f32, masked_kspace [1,E,C,H,W,2], sens [1,C,H,W,2],
    sampling_mask [1,1,1,H,W,1], tes [E] -> [1,4,H,W] quantitative map magnitudes."""
    B, n_maps, H, W = prediction.shape
    assert B == 1, "qVarNetBlock quantitative path assumes batch_size == 1"
    _, E, C, _, _, _ = masked_kspace.shape
    hid = params["w1"].shape[0]
    cin = 2 * E
    HW = H * W
    inv_n = 1.0 / float(HW)

    maps = prediction[0]                                      # (4, H, W)
    sens_re = sensitivity_maps[0, ..., 0]                     # (C, H, W)
    sens_im = sensitivity_maps[0, ..., 1]
    # masked k-space pre-transposed once to the (W, H) orientation used between the two
    # 1-D DFT stages, and cast to bf16: it is the only per-echo streaming DMA (halves
    # HBM traffic on v5e and the double-buffered VMEM footprint on v7x); values only
    # feed an elementwise subtract ahead of a bf16 matmul.
    mkt_re = jnp.transpose(masked_kspace[0, ..., 0], (0, 1, 3, 2)).astype(jnp.bfloat16)
    mkt_im = jnp.transpose(masked_kspace[0, ..., 1], (0, 1, 3, 2)).astype(jnp.bfloat16)
    # dc_weight folded into the transposed sampling mask -> no per-echo scalar broadcast
    mask_dcw = (jnp.transpose(sampling_mask[0, 0, 0, :, :, 0]).astype(jnp.float32)
                * params["dc_weight"].reshape(()).astype(jnp.float32))

    fh_re, fh_im = _dft_matrices_np(H)
    if W == H:
        fw_re, fw_im = fh_re, fh_im        # symmetric DFT matrix: reuse when square
    else:
        fw_re, fw_im = _dft_matrices_np(W)
    # concatenated-RHS complex-matmul operands: forward [F | iF]; inverse operands carry
    # the conjugation and (for the last stage) the 1/(H*W) 'backward' normalization.
    fwc = jnp.asarray(np.concatenate([fw_re, fw_im], axis=1), jnp.bfloat16)
    fhc = jnp.asarray(np.concatenate([fh_re, fh_im], axis=1), jnp.bfloat16)
    ifhc = jnp.asarray(np.concatenate([fh_re, -fh_im], axis=1), jnp.bfloat16)
    ifwc = jnp.asarray(np.concatenate([fw_re, -fw_im], axis=1) * inv_n, jnp.bfloat16)

    def invariant(shape):
        zero = (0,) * len(shape)
        # TODO(synk): single-buffer these grid-invariant blocks (pipeline_mode=
        #             pl.Buffered(1)) -- their block index never changes across the echo
        #             grid, so the second pipeline buffer is pure VMEM waste on v7x.
        return pl.BlockSpec(shape, lambda e, tes_ref, z=zero: z)

    # ---- kernel 1: coil-batched data consistency, one echo per grid step -------------
    grid_spec = pltpu.PrefetchScalarGridSpec(
        num_scalar_prefetch=1,                  # TEs live in SMEM, read as true scalars
        grid=(E,),
        in_specs=[
            invariant((n_maps, H, W)),                               # quantitative maps
            invariant((C, H, W)), invariant((C, H, W)),              # sens re / im
            pl.BlockSpec((1, C, W, H), lambda e, tes_ref: (e, 0, 0, 0)),  # kspace^T re
            pl.BlockSpec((1, C, W, H), lambda e, tes_ref: (e, 0, 0, 0)),  # kspace^T im
            invariant((W, H)),                                       # mask^T * dc_weight
            invariant((W, 2 * W)), invariant((H, 2 * H)),            # forward DFT [F|iF]
            invariant((H, 2 * H)), invariant((W, 2 * W)),            # inverse DFT (conj, 1/N)
        ],
        out_specs=pl.BlockSpec((2, 1, H, W), lambda e, tes_ref: (0, e, 0, 0)),
    )
    red = pl.pallas_call(
        dc_kernel,
        out_shape=jax.ShapeDtypeStruct((2, E, H, W), jnp.float32),   # [re|im, echo, H, W]
        grid_spec=grid_spec,
        compiler_params=pltpu.CompilerParams(
            dimension_semantics=("parallel",),       # echoes can split across TCs (v7x)
            vmem_limit_bytes=_dc_vmem_limit_bytes(C, H, W)),
    )(tes.astype(jnp.float32), maps, sens_re, sens_im, mkt_re, mkt_im, mask_dcw,
      fwc, fhc, ifhc, ifwc)

    # contiguous HBM reshapes only (no data movement): channels = [re(e0..), im(e0..)]
    x_flat = red.reshape(cin, HW)
    pred_flat = maps.reshape(n_maps, HW)

    # conv weights flattened once (tiny): (hid, 2E, 3, 3) -> (hid, 9*2E), tap-major K
    w1_flat = jnp.transpose(params["w1"], (0, 2, 3, 1)).reshape(hid, 9 * cin)
    w1_flat = w1_flat.astype(jnp.bfloat16)
    b1 = params["b1"].reshape(hid, 1).astype(jnp.float32)
    w2 = params["w2"][:, :, 0, 0].astype(jnp.bfloat16)               # (2*n_maps, hid)
    b2 = params["b2"].reshape(2 * n_maps, 1).astype(jnp.float32)

    # ---- kernel 2: fused regularizer conv + epilogue (lane-dense H*W layout) ---------
    # TODO(synk): at production H*W, tile the lane axis (grid over 2-8K-lane tiles with
    #             a +/-(W+1) halo, marked 'parallel') so both v7x cores pipeline this.
    out_flat = pl.pallas_call(
        functools.partial(model_finalize_kernel, img_h=H, img_w=W),
        out_shape=jax.ShapeDtypeStruct((n_maps, HW), jnp.float32),
        grid=(1,),
        in_specs=[
            pl.BlockSpec((cin, HW), lambda i: (0, 0)),
            pl.BlockSpec((n_maps, HW), lambda i: (0, 0)),
            pl.BlockSpec((hid, 9 * cin), lambda i: (0, 0)),
            pl.BlockSpec((hid, 1), lambda i: (0, 0)),
            pl.BlockSpec((2 * n_maps, hid), lambda i: (0, 0)),
            pl.BlockSpec((2 * n_maps, 1), lambda i: (0, 0)),
        ],
        out_specs=pl.BlockSpec((n_maps, HW), lambda i: (0, 0)),
        compiler_params=pltpu.CompilerParams(
            vmem_limit_bytes=_finalize_vmem_limit_bytes(cin, hid, n_maps, HW)),
    )(x_flat, pred_flat, w1_flat, b1, w2, b2)

    return out_flat.reshape(1, n_maps, H, W)


def reference_forward(prediction, masked_kspace, sensitivity_maps,
                      sampling_mask, tes, params):
    """Pure-JAX reference replicating the torch forward semantics."""
    B, n_maps, H, W = prediction.shape
    _, E, C, _, _, _ = masked_kspace.shape
    r2, s0, b0, phi = (prediction[:, i] for i in range(4))      # (1, H, W)
    sigs = []
    for i in range(E):
        ft = jnp.exp(-tes[i] * SCALING * r2)
        ct = jnp.cos(b0 * SCALING * (-tes[i]))
        st = jnp.sin(b0 * SCALING * (-tes[i]))
        sigs.append((s0 * ft * ct - phi * ft * st) + 1j * (s0 * ft * st + phi * ft * ct))
    sig = jnp.stack(sigs, axis=1)                               # (1, E, H, W) complex
    sens = sensitivity_maps[..., 0] + 1j * sensitivity_maps[..., 1]   # (1, C, H, W)
    mc = sig[:, :, None] * sens[:, None]                        # (1, E, C, H, W)
    ksp = jnp.fft.fft2(mc, axes=(-2, -1), norm="backward")
    mkc = masked_kspace[..., 0] + 1j * masked_kspace[..., 1]
    mask = sampling_mask[..., 0]                                # (1, 1, 1, H, W)
    soft = (ksp - mkc) * mask * params["dc_weight"][0]
    img = jnp.fft.ifft2(soft, axes=(-2, -1), norm="backward")
    red = (img * jnp.conj(sens[:, None])).sum(axis=2)           # (1, E, H, W)
    x = jnp.concatenate([red.real, red.imag], axis=1).astype(jnp.float32)
    h1 = lax.conv_general_dilated(x, params["w1"], (1, 1), "SAME",
                                  dimension_numbers=("NCHW", "OIHW", "NCHW"))
    h1 = jnp.maximum(h1 + params["b1"][None, :, None, None], 0.0)
    y = lax.conv_general_dilated(h1, params["w2"], (1, 1), "SAME",
                                 dimension_numbers=("NCHW", "OIHW", "NCHW"))
    y = y + params["b2"][None, :, None, None]
    out_re = prediction + y[:, :n_maps]
    out_im = y[:, n_maps:]
    out_re = out_re.at[:, 0].set(jnp.maximum(out_re[:, 0], 0.0))
    out_im = out_im.at[:, 0].set(jnp.maximum(out_im[:, 0], 0.0))
    return jnp.sqrt(out_re ** 2 + out_im ** 2)


if __name__ == "__main__":
    H = W = 16
    E, C, n_maps, hid = 4, 4, 4, 32

    key = jax.random.PRNGKey(0)
    ks = jax.random.split(key, 8)
    prediction = jax.random.normal(ks[0], (1, n_maps, H, W), jnp.float32)
    masked_kspace = jax.random.normal(ks[1], (1, E, C, H, W, 2), jnp.float32)
    sensitivity_maps = 0.5 * jax.random.normal(ks[2], (1, C, H, W, 2), jnp.float32)
    sampling_mask = (jax.random.uniform(ks[3], (1, 1, 1, H, W, 1)) > 0.5).astype(jnp.float32)
    tes = jnp.array([3.0, 11.5, 20.0, 28.5], jnp.float32)       # default MEGRE echo times

    params = {
        "dc_weight": jnp.ones((1,), jnp.float32),               # torch.nn.Parameter(torch.ones(1))
        "w1": 0.1 * jax.random.normal(ks[4], (hid, 2 * E, 3, 3), jnp.float32),
        "b1": 0.1 * jax.random.normal(ks[5], (hid,), jnp.float32),
        "w2": 0.1 * jax.random.normal(ks[6], (2 * n_maps, hid, 1, 1), jnp.float32),
        "b2": 0.1 * jax.random.normal(ks[7], (2 * n_maps,), jnp.float32),
    }

    out = qvarnet_block_forward(prediction, masked_kspace, sensitivity_maps,
                                sampling_mask, tes, params)
    out = jax.block_until_ready(out)

    ref = reference_forward(prediction, masked_kspace, sensitivity_maps,
                            sampling_mask, tes, params)
    assert out.shape == (1, n_maps, H, W), out.shape
    # tolerance accounts for bf16 MXU operands / bf16 k-space through the 2-stage
    # DFT/IDFT path; structural bugs produce errors orders of magnitude larger.
    if not jnp.allclose(out, ref, atol=1e-1, rtol=5e-2):
        raise AssertionError(
            f"mismatch vs reference, max abs err = {float(jnp.max(jnp.abs(out - ref)))}")
    print("KERNEL_OK")
</pallas_src>

<mosaic_0001>
module attributes {stable_mosaic.version = 11 : i64} {
  func.func @dc_kernel(%arg0: i32, %arg1: memref<4xf32, #tpu.memory_space<smem>>, %arg2: memref<4x16x16xf32, #tpu.memory_space<vmem>>, %arg3: memref<4x16x16xf32, #tpu.memory_space<vmem>>, %arg4: memref<4x16x16xf32, #tpu.memory_space<vmem>>, %arg5: memref<1x4x16x16xbf16, #tpu.memory_space<vmem>>, %arg6: memref<1x4x16x16xbf16, #tpu.memory_space<vmem>>, %arg7: memref<16x16xf32, #tpu.memory_space<vmem>>, %arg8: memref<16x32xbf16, #tpu.memory_space<vmem>>, %arg9: memref<16x32xbf16, #tpu.memory_space<vmem>>, %arg10: memref<16x32xbf16, #tpu.memory_space<vmem>>, %arg11: memref<16x32xbf16, #tpu.memory_space<vmem>>, %arg12: memref<2x1x16x16xf32, #tpu.memory_space<vmem>>) attributes {dimension_semantics = [#tpu.dimension_semantics<parallel>], iteration_bounds = array<i64: 4>, scalar_prefetch = 1 : i64, scratch_operands = 0 : i64, tpu.core_type = #tpu.core_type<tc>, window_params = [{pipeline_mode = #tpu.pipeline_mode<synchronous>, transform_indices = @transform_0, window_bounds = array<i64: 4, 16, 16>}, {pipeline_mode = #tpu.pipeline_mode<synchronous>, transform_indices = @transform_1, window_bounds = array<i64: 4, 16, 16>}, {pipeline_mode = #tpu.pipeline_mode<synchronous>, transform_indices = @transform_2, window_bounds = array<i64: 4, 16, 16>}, {transform_indices = @transform_3, window_bounds = array<i64: 1, 4, 16, 16>}, {transform_indices = @transform_4, window_bounds = array<i64: 1, 4, 16, 16>}, {pipeline_mode = #tpu.pipeline_mode<synchronous>, transform_indices = @transform_5, window_bounds = array<i64: 16, 16>}, {pipeline_mode = #tpu.pipeline_mode<synchronous>, transform_indices = @transform_6, window_bounds = array<i64: 16, 32>}, {pipeline_mode = #tpu.pipeline_mode<synchronous>, transform_indices = @transform_7, window_bounds = array<i64: 16, 32>}, {pipeline_mode = #tpu.pipeline_mode<synchronous>, transform_indices = @transform_8, window_bounds = array<i64: 16, 32>}, {pipeline_mode = #tpu.pipeline_mode<synchronous>, transform_indices = @transform_9, window_bounds = array<i64: 16, 32>}, {transform_indices = @transform_10, window_bounds = array<i64: 2, 1, 16, 16>}]} {
    %0 = arith.index_cast %arg0 : i32 to index
    %1 = memref.load %arg1[%0] : memref<4xf32, #tpu.memory_space<smem>>
    %c0 = arith.constant 0 : index
    %c0_0 = arith.constant 0 : index
    %c0_1 = arith.constant 0 : index
    %2 = vector.load %arg2[%c0, %c0_0, %c0_1] : memref<4x16x16xf32, #tpu.memory_space<vmem>>, vector<1x16x16xf32>
    %3 = vector.shape_cast %2 : vector<1x16x16xf32> to vector<16x16xf32>
    %c1 = arith.constant 1 : index
    %c0_2 = arith.constant 0 : index
    %c0_3 = arith.constant 0 : index
    %4 = vector.load %arg2[%c1, %c0_2, %c0_3] : memref<4x16x16xf32, #tpu.memory_space<vmem>>, vector<1x16x16xf32>
    %5 = vector.shape_cast %4 : vector<1x16x16xf32> to vector<16x16xf32>
    %c2 = arith.constant 2 : index
    %c0_4 = arith.constant 0 : index
    %c0_5 = arith.constant 0 : index
    %6 = vector.load %arg2[%c2, %c0_4, %c0_5] : memref<4x16x16xf32, #tpu.memory_space<vmem>>, vector<1x16x16xf32>
    %7 = vector.shape_cast %6 : vector<1x16x16xf32> to vector<16x16xf32>
    %c3 = arith.constant 3 : index
    %c0_6 = arith.constant 0 : index
    %c0_7 = arith.constant 0 : index
    %8 = vector.load %arg2[%c3, %c0_6, %c0_7] : memref<4x16x16xf32, #tpu.memory_space<vmem>>, vector<1x16x16xf32>
    %9 = vector.shape_cast %8 : vector<1x16x16xf32> to vector<16x16xf32>
    %cst = arith.constant 0.000000e+00 : f32
    %10 = arith.subf %cst, %1 : f32
    %cst_8 = arith.constant 1.000000e-03 : f32
    %11 = arith.mulf %10, %cst_8 : f32
    %12 = vector.broadcast %11 : f32 to vector<16x16xf32>
    %13 = arith.mulf %12, %3 : vector<16x16xf32>
    %14 = math.exp %13 : vector<16x16xf32>
    %cst_9 = arith.constant 0.000000e+00 : f32
    %15 = arith.subf %cst_9, %1 : f32
    %cst_10 = arith.constant 1.000000e-03 : f32
    %16 = arith.mulf %cst_10, %15 : f32
    %17 = vector.broadcast %16 : f32 to vector<16x16xf32>
    %18 = arith.mulf %7, %17 : vector<16x16xf32>
    %19 = math.cos %18 : vector<16x16xf32>
    %cst_11 = arith.constant 0.000000e+00 : f32
    %20 = arith.subf %cst_11, %1 : f32
    %cst_12 = arith.constant 1.000000e-03 : f32
    %21 = arith.mulf %cst_12, %20 : f32
    %22 = vector.broadcast %21 : f32 to vector<16x16xf32>
    %23 = arith.mulf %7, %22 : vector<16x16xf32>
    %24 = math.sin %23 : vector<16x16xf32>
    %25 = arith.mulf %5, %14 : vector<16x16xf32>
    %26 = arith.mulf %25, %19 : vector<16x16xf32>
    %27 = arith.mulf %9, %14 : vector<16x16xf32>
    %28 = arith.mulf %27, %24 : vector<16x16xf32>
    %29 = arith.subf %26, %28 : vector<16x16xf32>
    %30 = arith.mulf %5, %14 : vector<16x16xf32>
    %31 = arith.mulf %30, %24 : vector<16x16xf32>
    %32 = arith.mulf %9, %14 : vector<16x16xf32>
    %33 = arith.mulf %32, %19 : vector<16x16xf32>
    %34 = arith.addf %31, %33 : vector<16x16xf32>
    %35 = arith.cmpf one, %29, %29 : vector<16x16xf32>
    %cst_13 = arith.constant 0.000000e+00 : f32
    %36 = vector.broadcast %cst_13 : f32 to vector<16x16xf32>
    %37 = arith.select %35, %36, %29 : vector<16x16xi1>, vector<16x16xf32>
    %38 = arith.cmpf one, %34, %34 : vector<16x16xf32>
    %cst_14 = arith.constant 0.000000e+00 : f32
    %39 = vector.broadcast %cst_14 : f32 to vector<16x16xf32>
    %40 = arith.select %38, %39, %34 : vector<16x16xi1>, vector<16x16xf32>
    %c0_15 = arith.constant 0 : index
    %c0_16 = arith.constant 0 : index
    %c0_17 = arith.constant 0 : index
    %41 = vector.load %arg3[%c0_15, %c0_16, %c0_17] : memref<4x16x16xf32, #tpu.memory_space<vmem>>, vector<4x16x16xf32>
    %c0_18 = arith.constant 0 : index
    %c0_19 = arith.constant 0 : index
    %c0_20 = arith.constant 0 : index
    %42 = vector.load %arg4[%c0_18, %c0_19, %c0_20] : memref<4x16x16xf32, #tpu.memory_space<vmem>>, vector<4x16x16xf32>
    %43 = vector.shape_cast %37 : vector<16x16xf32> to vector<1x16x16xf32>
    %44 = vector.broadcast %43 : vector<1x16x16xf32> to vector<4x16x16xf32>
    %45 = arith.mulf %44, %41 : vector<4x16x16xf32>
    %46 = vector.shape_cast %40 : vector<16x16xf32> to vector<1x16x16xf32>
    %47 = vector.broadcast %46 : vector<1x16x16xf32> to vector<4x16x16xf32>
    %48 = arith.mulf %47, %42 : vector<4x16x16xf32>
    %49 = arith.subf %45, %48 : vector<4x16x16xf32>
    %50 = vector.shape_cast %37 : vector<16x16xf32> to vector<1x16x16xf32>
    %51 = vector.broadcast %50 : vector<1x16x16xf32> to vector<4x16x16xf32>
    %52 = arith.mulf %51, %42 : vector<4x16x16xf32>
    %53 = vector.shape_cast %40 : vector<16x16xf32> to vector<1x16x16xf32>
    %54 = vector.broadcast %53 : vector<1x16x16xf32> to vector<4x16x16xf32>
    %55 = arith.mulf %54, %41 : vector<4x16x16xf32>
    %56 = arith.addf %52, %55 : vector<4x16x16xf32>
    %57 = vector.shape_cast %49 : vector<4x16x16xf32> to vector<64x16xf32>
    %58 = vector.shape_cast %56 : vector<4x16x16xf32> to vector<64x16xf32>
    %c0_21 = arith.constant 0 : index
    %c0_22 = arith.constant 0 : index
    %59 = vector.load %arg8[%c0_21, %c0_22] : memref<16x32xbf16, #tpu.memory_space<vmem>>, vector<16x32xbf16>
    %60 = arith.truncf %57 : vector<64x16xf32> to vector<64x16xbf16>
    %61 = arith.truncf %58 : vector<64x16xf32> to vector<64x16xbf16>
    %cst_23 = arith.constant dense<0.000000e+00> : vector<64x32xf32>
    %62 = tpu.matmul %60, %59, %cst_23 {dimension_numbers = #tpu.dot_dimension_numbers<[1], [0], [0], [1], [0, 0, 1, 1], [], []>} : vector<64x16xbf16>, vector<16x32xbf16>, vector<64x32xf32> -> vector<64x32xf32>
    %cst_24 = arith.constant dense<0.000000e+00> : vector<64x32xf32>
    %63 = tpu.matmul %61, %59, %cst_24 {dimension_numbers = #tpu.dot_dimension_numbers<[1], [0], [0], [1], [0, 0, 1, 1], [], []>} : vector<64x16xbf16>, vector<16x32xbf16>, vector<64x32xf32> -> vector<64x32xf32>
    %64 = vector.extract_strided_slice %62 {offsets = [0, 0], sizes = [64, 16], strides = [1, 1]} : vector<64x32xf32> to vector<64x16xf32>
    %65 = vector.extract_strided_slice %63 {offsets = [0, 16], sizes = [64, 16], strides = [1, 1]} : vector<64x32xf32> to vector<64x16xf32>
    %66 = arith.subf %64, %65 : vector<64x16xf32>
    %67 = vector.extract_strided_slice %62 {offsets = [0, 16], sizes = [64, 16], strides = [1, 1]} : vector<64x32xf32> to vector<64x16xf32>
    %68 = vector.extract_strided_slice %63 {offsets = [0, 0], sizes = [64, 16], strides = [1, 1]} : vector<64x32xf32> to vector<64x16xf32>
    %69 = arith.addf %67, %68 : vector<64x16xf32>
    %70 = vector.shape_cast %66 : vector<64x16xf32> to vector<4x16x16xf32>
    %71 = tpu.transpose %70, [0, 2, 1] : vector<4x16x16xf32> -> vector<4x16x16xf32>
    %72 = vector.shape_cast %71 : vector<4x16x16xf32> to vector<64x16xf32>
    %73 = vector.shape_cast %69 : vector<64x16xf32> to vector<4x16x16xf32>
    %74 = tpu.transpose %73, [0, 2, 1] : vector<4x16x16xf32> -> vector<4x16x16xf32>
    %75 = vector.shape_cast %74 : vector<4x16x16xf32> to vector<64x16xf32>
    %c0_25 = arith.constant 0 : index
    %c0_26 = arith.constant 0 : index
    %76 = vector.load %arg9[%c0_25, %c0_26] : memref<16x32xbf16, #tpu.memory_space<vmem>>, vector<16x32xbf16>
    %77 = arith.truncf %72 : vector<64x16xf32> to vector<64x16xbf16>
    %78 = arith.truncf %75 : vector<64x16xf32> to vector<64x16xbf16>
    %cst_27 = arith.constant dense<0.000000e+00> : vector<64x32xf32>
    %79 = tpu.matmul %77, %76, %cst_27 {dimension_numbers = #tpu.dot_dimension_numbers<[1], [0], [0], [1], [0, 0, 1, 1], [], []>} : vector<64x16xbf16>, vector<16x32xbf16>, vector<64x32xf32> -> vector<64x32xf32>
    %cst_28 = arith.constant dense<0.000000e+00> : vector<64x32xf32>
    %80 = tpu.matmul %78, %76, %cst_28 {dimension_numbers = #tpu.dot_dimension_numbers<[1], [0], [0], [1], [0, 0, 1, 1], [], []>} : vector<64x16xbf16>, vector<16x32xbf16>, vector<64x32xf32> -> vector<64x32xf32>
    %81 = vector.extract_strided_slice %79 {offsets = [0, 0], sizes = [64, 16], strides = [1, 1]} : vector<64x32xf32> to vector<64x16xf32>
    %82 = vector.extract_strided_slice %80 {offsets = [0, 16], sizes = [64, 16], strides = [1, 1]} : vector<64x32xf32> to vector<64x16xf32>
    %83 = arith.subf %81, %82 : vector<64x16xf32>
    %84 = vector.extract_strided_slice %79 {offsets = [0, 16], sizes = [64, 16], strides = [1, 1]} : vector<64x32xf32> to vector<64x16xf32>
    %85 = vector.extract_strided_slice %80 {offsets = [0, 0], sizes = [64, 16], strides = [1, 1]} : vector<64x32xf32> to vector<64x16xf32>
    %86 = arith.addf %84, %85 : vector<64x16xf32>
    %c0_29 = arith.constant 0 : index
    %c0_30 = arith.constant 0 : index
    %87 = vector.load %arg7[%c0_29, %c0_30] : memref<16x16xf32, #tpu.memory_space<vmem>>, vector<16x16xf32>
    %88 = vector.shape_cast %83 : vector<64x16xf32> to vector<4x16x16xf32>
    %c0_31 = arith.constant 0 : index
    %c0_32 = arith.constant 0 : index
    %c0_33 = arith.constant 0 : index
    %c0_34 = arith.constant 0 : index
    %89 = vector.load %arg5[%c0_31, %c0_32, %c0_33, %c0_34] : memref<1x4x16x16xbf16, #tpu.memory_space<vmem>>, vector<1x4x16x16xbf16>
    %90 = vector.shape_cast %89 : vector<1x4x16x16xbf16> to vector<4x16x16xbf16>
    %91 = arith.extf %90 : vector<4x16x16xbf16> to vector<4x16x16xf32>
    %92 = arith.subf %88, %91 : vector<4x16x16xf32>
    %93 = vector.shape_cast %87 : vector<16x16xf32> to vector<1x16x16xf32>
    %94 = vector.broadcast %93 : vector<1x16x16xf32> to vector<4x16x16xf32>
    %95 = arith.mulf %92, %94 : vector<4x16x16xf32>
    %96 = vector.shape_cast %86 : vector<64x16xf32> to vector<4x16x16xf32>
    %c0_35 = arith.constant 0 : index
    %c0_36 = arith.constant 0 : index
    %c0_37 = arith.constant 0 : index
    %c0_38 = arith.constant 0 : index
    %97 = vector.load %arg6[%c0_35, %c0_36, %c0_37, %c0_38] : memref<1x4x16x16xbf16, #tpu.memory_space<vmem>>, vector<1x4x16x16xbf16>
    %98 = vector.shape_cast %97 : vector<1x4x16x16xbf16> to vector<4x16x16xbf16>
    %99 = arith.extf %98 : vector<4x16x16xbf16> to vector<4x16x16xf32>
    %100 = arith.subf %96, %99 : vector<4x16x16xf32>
    %101 = vector.shape_cast %87 : vector<16x16xf32> to vector<1x16x16xf32>
    %102 = vector.broadcast %101 : vector<1x16x16xf32> to vector<4x16x16xf32>
    %103 = arith.mulf %100, %102 : vector<4x16x16xf32>
    %104 = vector.shape_cast %95 : vector<4x16x16xf32> to vector<64x16xf32>
    %105 = vector.shape_cast %103 : vector<4x16x16xf32> to vector<64x16xf32>
    %c0_39 = arith.constant 0 : index
    %c0_40 = arith.constant 0 : index
    %106 = vector.load %arg10[%c0_39, %c0_40] : memref<16x32xbf16, #tpu.memory_space<vmem>>, vector<16x32xbf16>
    %107 = arith.truncf %104 : vector<64x16xf32> to vector<64x16xbf16>
    %108 = arith.truncf %105 : vector<64x16xf32> to vector<64x16xbf16>
    %cst_41 = arith.constant dense<0.000000e+00> : vector<64x32xf32>
    %109 = tpu.matmul %107, %106, %cst_41 {dimension_numbers = #tpu.dot_dimension_numbers<[1], [0], [0], [1], [0, 0, 1, 1], [], []>} : vector<64x16xbf16>, vector<16x32xbf16>, vector<64x32xf32> -> vector<64x32xf32>
    %cst_42 = arith.constant dense<0.000000e+00> : vector<64x32xf32>
    %110 = tpu.matmul %108, %106, %cst_42 {dimension_numbers = #tpu.dot_dimension_numbers<[1], [0], [0], [1], [0, 0, 1, 1], [], []>} : vector<64x16xbf16>, vector<16x32xbf16>, vector<64x32xf32> -> vector<64x32xf32>
    %111 = vector.extract_strided_slice %109 {offsets = [0, 0], sizes = [64, 16], strides = [1, 1]} : vector<64x32xf32> to vector<64x16xf32>
    %112 = vector.extract_strided_slice %110 {offsets = [0, 16], sizes = [64, 16], strides = [1, 1]} : vector<64x32xf32> to vector<64x16xf32>
    %113 = arith.subf %111, %112 : vector<64x16xf32>
    %114 = vector.extract_strided_slice %109 {offsets = [0, 16], sizes = [64, 16], strides = [1, 1]} : vector<64x32xf32> to vector<64x16xf32>
    %115 = vector.extract_strided_slice %110 {offsets = [0, 0], sizes = [64, 16], strides = [1, 1]} : vector<64x32xf32> to vector<64x16xf32>
    %116 = arith.addf %114, %115 : vector<64x16xf32>
    %117 = vector.shape_cast %113 : vector<64x16xf32> to vector<4x16x16xf32>
    %118 = tpu.transpose %117, [0, 2, 1] : vector<4x16x16xf32> -> vector<4x16x16xf32>
    %119 = vector.shape_cast %118 : vector<4x16x16xf32> to vector<64x16xf32>
    %120 = vector.shape_cast %116 : vector<64x16xf32> to vector<4x16x16xf32>
    %121 = tpu.transpose %120, [0, 2, 1] : vector<4x16x16xf32> -> vector<4x16x16xf32>
    %122 = vector.shape_cast %121 : vector<4x16x16xf32> to vector<64x16xf32>
    %c0_43 = arith.constant 0 : index
    %c0_44 = arith.constant 0 : index
    %123 = vector.load %arg11[%c0_43, %c0_44] : memref<16x32xbf16, #tpu.memory_space<vmem>>, vector<16x32xbf16>
    %124 = arith.truncf %119 : vector<64x16xf32> to vector<64x16xbf16>
    %125 = arith.truncf %122 : vector<64x16xf32> to vector<64x16xbf16>
    %cst_45 = arith.constant dense<0.000000e+00> : vector<64x32xf32>
    %126 = tpu.matmul %124, %123, %cst_45 {dimension_numbers = #tpu.dot_dimension_numbers<[1], [0], [0], [1], [0, 0, 1, 1], [], []>} : vector<64x16xbf16>, vector<16x32xbf16>, vector<64x32xf32> -> vector<64x32xf32>
    %cst_46 = arith.constant dense<0.000000e+00> : vector<64x32xf32>
    %127 = tpu.matmul %125, %123, %cst_46 {dimension_numbers = #tpu.dot_dimension_numbers<[1], [0], [0], [1], [0, 0, 1, 1], [], []>} : vector<64x16xbf16>, vector<16x32xbf16>, vector<64x32xf32> -> vector<64x32xf32>
    %128 = vector.extract_strided_slice %126 {offsets = [0, 0], sizes = [64, 16], strides = [1, 1]} : vector<64x32xf32> to vector<64x16xf32>
    %129 = vector.extract_strided_slice %127 {offsets = [0, 16], sizes = [64, 16], strides = [1, 1]} : vector<64x32xf32> to vector<64x16xf32>
    %130 = arith.subf %128, %129 : vector<64x16xf32>
    %131 = vector.extract_strided_slice %126 {offsets = [0, 16], sizes = [64, 16], strides = [1, 1]} : vector<64x32xf32> to vector<64x16xf32>
    %132 = vector.extract_strided_slice %127 {offsets = [0, 0], sizes = [64, 16], strides = [1, 1]} : vector<64x32xf32> to vector<64x16xf32>
    %133 = arith.addf %131, %132 : vector<64x16xf32>
    %134 = vector.shape_cast %130 : vector<64x16xf32> to vector<4x16x16xf32>
    %135 = vector.shape_cast %133 : vector<64x16xf32> to vector<4x16x16xf32>
    %136 = arith.mulf %134, %41 : vector<4x16x16xf32>
    %137 = arith.mulf %135, %42 : vector<4x16x16xf32>
    %138 = arith.addf %136, %137 : vector<4x16x16xf32>
    %cst_47 = arith.constant dense<0.000000e+00> : vector<16x16xf32>
    %139 = vector.multi_reduction <add>, %138, %cst_47 [0] : vector<4x16x16xf32> to vector<16x16xf32>
    %c0_48 = arith.constant 0 : index
    %c0_49 = arith.constant 0 : index
    %c0_50 = arith.constant 0 : index
    %c0_51 = arith.constant 0 : index
    %140 = vector.load %arg12[%c0_48, %c0_49, %c0_50, %c0_51] : memref<2x1x16x16xf32, #tpu.memory_space<vmem>>, vector<1x1x16x16xf32>
    %141 = vector.shape_cast %140 : vector<1x1x16x16xf32> to vector<16x16xf32>
    %142 = vector.shape_cast %139 : vector<16x16xf32> to vector<1x1x16x16xf32>
    tpu.vector_store %arg12[%c0_48, %c0_49, %c0_50, %c0_51], %142 {strides = array<i32>} : memref<2x1x16x16xf32, #tpu.memory_space<vmem>>, vector<1x1x16x16xf32>,
    %143 = arith.mulf %135, %41 : vector<4x16x16xf32>
    %144 = arith.mulf %134, %42 : vector<4x16x16xf32>
    %145 = arith.subf %143, %144 : vector<4x16x16xf32>
    %cst_52 = arith.constant dense<0.000000e+00> : vector<16x16xf32>
    %146 = vector.multi_reduction <add>, %145, %cst_52 [0] : vector<4x16x16xf32> to vector<16x16xf32>
    %c1_53 = arith.constant 1 : index
    %c0_54 = arith.constant 0 : index
    %c0_55 = arith.constant 0 : index
    %c0_56 = arith.constant 0 : index
    %147 = vector.load %arg12[%c1_53, %c0_54, %c0_55, %c0_56] : memref<2x1x16x16xf32, #tpu.memory_space<vmem>>, vector<1x1x16x16xf32>
    %148 = vector.shape_cast %147 : vector<1x1x16x16xf32> to vector<16x16xf32>
    %149 = vector.shape_cast %146 : vector<16x16xf32> to vector<1x1x16x16xf32>
    tpu.vector_store %arg12[%c1_53, %c0_54, %c0_55, %c0_56], %149 {strides = array<i32>} : memref<2x1x16x16xf32, #tpu.memory_space<vmem>>, vector<1x1x16x16xf32>,
    return
  }
  func.func @transform_0(%arg0: i32, %arg1: memref<4xf32, #tpu.memory_space<smem>>) -> (i32, i32, i32) {
    %c0_i32 = arith.constant 0 : i32
    %c0_i32_0 = arith.constant 0 : i32
    %c0_i32_1 = arith.constant 0 : i32
    %c0_i32_2 = arith.constant 0 : i32
    return %c0_i32, %c0_i32_0, %c0_i32_1 : i32, i32, i32
  }
  func.func @transform_1(%arg0: i32, %arg1: memref<4xf32, #tpu.memory_space<smem>>) -> (i32, i32, i32) {
    %c0_i32 = arith.constant 0 : i32
    %c0_i32_0 = arith.constant 0 : i32
    %c0_i32_1 = arith.constant 0 : i32
    %c0_i32_2 = arith.constant 0 : i32
    return %c0_i32, %c0_i32_0, %c0_i32_1 : i32, i32, i32
  }
  func.func @transform_2(%arg0: i32, %arg1: memref<4xf32, #tpu.memory_space<smem>>) -> (i32, i32, i32) {
    %c0_i32 = arith.constant 0 : i32
    %c0_i32_0 = arith.constant 0 : i32
    %c0_i32_1 = arith.constant 0 : i32
    %c0_i32_2 = arith.constant 0 : i32
    return %c0_i32, %c0_i32_0, %c0_i32_1 : i32, i32, i32
  }
  func.func @transform_3(%arg0: i32, %arg1: memref<4xf32, #tpu.memory_space<smem>>) -> (i32, i32, i32, i32) {
    %c0_i32 = arith.constant 0 : i32
    %c0_i32_0 = arith.constant 0 : i32
    %c0_i32_1 = arith.constant 0 : i32
    %c0_i32_2 = arith.constant 0 : i32
    return %arg0, %c0_i32, %c0_i32_0, %c0_i32_1 : i32, i32, i32, i32
  }
  func.func @transform_4(%arg0: i32, %arg1: memref<4xf32, #tpu.memory_space<smem>>) -> (i32, i32, i32, i32) {
    %c0_i32 = arith.constant 0 : i32
    %c0_i32_0 = arith.constant 0 : i32
    %c0_i32_1 = arith.constant 0 : i32
    %c0_i32_2 = arith.constant 0 : i32
    return %arg0, %c0_i32, %c0_i32_0, %c0_i32_1 : i32, i32, i32, i32
  }
  func.func @transform_5(%arg0: i32, %arg1: memref<4xf32, #tpu.memory_space<smem>>) -> (i32, i32) {
    %c0_i32 = arith.constant 0 : i32
    %c0_i32_0 = arith.constant 0 : i32
    %c0_i32_1 = arith.constant 0 : i32
    return %c0_i32, %c0_i32_0 : i32, i32
  }
  func.func @transform_6(%arg0: i32, %arg1: memref<4xf32, #tpu.memory_space<smem>>) -> (i32, i32) {
    %c0_i32 = arith.constant 0 : i32
    %c0_i32_0 = arith.constant 0 : i32
    %c0_i32_1 = arith.constant 0 : i32
    return %c0_i32, %c0_i32_0 : i32, i32
  }
  func.func @transform_7(%arg0: i32, %arg1: memref<4xf32, #tpu.memory_space<smem>>) -> (i32, i32) {
    %c0_i32 = arith.constant 0 : i32
    %c0_i32_0 = arith.constant 0 : i32
    %c0_i32_1 = arith.constant 0 : i32
    return %c0_i32, %c0_i32_0 : i32, i32
  }
  func.func @transform_8(%arg0: i32, %arg1: memref<4xf32, #tpu.memory_space<smem>>) -> (i32, i32) {
    %c0_i32 = arith.constant 0 : i32
    %c0_i32_0 = arith.constant 0 : i32
    %c0_i32_1 = arith.constant 0 : i32
    return %c0_i32, %c0_i32_0 : i32, i32
  }
  func.func @transform_9(%arg0: i32, %arg1: memref<4xf32, #tpu.memory_space<smem>>) -> (i32, i32) {
    %c0_i32 = arith.constant 0 : i32
    %c0_i32_0 = arith.constant 0 : i32
    %c0_i32_1 = arith.constant 0 : i32
    return %c0_i32, %c0_i32_0 : i32, i32
  }
  func.func @transform_10(%arg0: i32, %arg1: memref<4xf32, #tpu.memory_space<smem>>) -> (i32, i32, i32, i32) {
    %c0_i32 = arith.constant 0 : i32
    %c0_i32_0 = arith.constant 0 : i32
    %c0_i32_1 = arith.constant 0 : i32
    %c0_i32_2 = arith.constant 0 : i32
    return %c0_i32, %arg0, %c0_i32_0, %c0_i32_1 : i32, i32, i32, i32
  }
}

</mosaic_0001>

<bundles_post_ra>
// kernel: tpu_custom_call.1
= control target key start
LH: loop header
LB: loop body
LE: loop exit
PB: predicated region body
PF: predicated region fallthrough
CT: control target
= control target key end

     0   :  { %s4908_s0 = inlined_call_operand.hbm [shape: f32[4], index: 0, kind: input, shape index: {}]   ;;  %s4909_s1 = inlined_call_operand.hbm [shape: f32[4,16,16], index: 1, kind: input, shape index: {}]   ;;  %s4910_s2 = inlined_call_operand.hbm [shape: f32[4,16,16], index: 2, kind: input, shape index: {}]   ;;  %s4911_s3 = inlined_call_operand.hbm [shape: f32[4,16,16], index: 3, kind: input, shape index: {}]   ;;  %s4912_s4 = inlined_call_operand.hbm [shape: bf16[4,4,16,16], index: 4, kind: input, shape index: {}]   ;;  %s4913_s5 = inlined_call_operand.hbm [shape: bf16[4,4,16,16], index: 5, kind: input, shape index: {}]   ;;  %s4914_s6 = inlined_call_operand.vmem [shape: f32[16,16], index: 6, kind: input, shape index: {}]   ;;  %s4915_s7 = inlined_call_operand.vmem [shape: bf16[16,32], index: 7, kind: input, shape index: {}]   ;;  %s4916_s8 = inlined_call_operand.hbm [shape: bf16[16,32], index: 8, kind: input, shape index: {}]   ;;  %s4917_s9 = inlined_call_operand.vmem [shape: bf16[16,32], index: 9, kind: input, shape index: {}]   ;;  %s4918_s10 = inlined_call_operand.hbm [shape: bf16[16,32], index: 10, kind: input, shape index: {}]   ;;  %s4919_s11 = inlined_call_operand.hbm [shape: f32[2,4,16,16], index: 11, kind: output, shape index: {}]  }
   0x1   :  { %4946 = sst [smem:[#allocation32_spill]] %s4910_s2  ;;  %s3670_s19 = scalar_lea.hbm %s4908_s0, 16 }
   0x2   :  { %4947 = sst [smem:[#allocation33_spill]] %s4912_s4  ;;  %p3671_p0 = scmp.ne.s32.totalorder %s4908_s0, %s3670_s19 }
   0x3   :  { %4948 = sst [smem:[#allocation34_spill]] %s4914_s6  ;;  %p3674_p1 = scmp.lt.u32.totalorder %s3670_s19, %s4908_s0 }
   0x4   :  { %4949 = sst [smem:[#allocation35_spill]] %s4915_s7 }
   0x5   :  { %4950 = sst [smem:[#allocation36_spill]] %s4916_s8  ;;  %p3676_p2 = pnand %p3674_p1, %p3671_p0 }
   0x6   :  { %4951 = sst [smem:[#allocation37_spill]] %s4917_s9 }
   0x7   :  { %4952 = sst [smem:[#allocation38_spill]] %s4919_s11 }
   0x8   :  { %3679 = shalt.err (!%p3676_p2)  }
   0x9   :  { %s3934_s24 = smov [#allocation3]  }
   0xa   :  { %17 = dma.hbm_to_smem %s4908_s0, 16, %s3934_s24, [#allocation2] }
   0xb   :  { %3896 = dma.done.wait [#allocation2], 16 }
   0xc   :  { %3897 = vsyncadd [#allocation2], 4294967280 }
   0xd   :  { %19 = sfence }
   0xe   :  { %20 = vsyncpa [#allocation5], 0 }
   0xf   :  { %21 = vsyncpa [#allocation8], 0 }
  0x10   :  { %22 = vsyncpa [#allocation11], 0 }
  0x11   :  { %24 = vsyncpa [#allocation11 + $0x1], 0 }
  0x12   :  { %25 = vsyncpa [#allocation14], 0 }
  0x13   :  { %26 = vsyncpa [#allocation6], 0 }
  0x14   :  { %28 = vsyncpa [#allocation6 + $0x1], 0  ;;  %s4033_s27 = smov 0   ;;  %s4035_s28 = smov 0  }
  0x15   :  { %s4037_s29 = smov 0   ;;  %s4039_s30 = smov 0  }
  0x16 LB: > { %4953 = sst [smem:[#allocation25_spill]] %s3920_s27  ;;  %s4054_s0 = sadd.s32 4294967295, %s3932_s30   ;;  %s3932_s30 = sphi %s4039_s30, %s4999_s30   ;;  %s3928_s29 = sphi %s4037_s29, %s5001_s29   ;;  %s3924_s28 = sphi %s4035_s28, %s5003_s28   ;;  %s3920_s27 = sphi %s4033_s27, %s5002_s27  }
  0x17   : > { %4954 = sst [smem:[#allocation26_spill]] %s3928_s29  ;;  %p3087_p3 = scmp.ge.s32.totalorder %s3932_s30, 1 }
  0x18   : > { %4955 = sst [smem:[#allocation27_spill]] %s3932_s30  ;;  %p4920_p4 = scmp.eq.s32.totalorder %s4054_s0, 0 }
  0x19   : > { %p285_p5 = scmp.lt.s32.totalorder %s3932_s30, 5  ;;  %s3935_s13 = smov [#allocation7]  }
  0x1a   : > { %s310_s14 = sshll.u32 %s3935_s13, 4  ;;  %s3936_s15 = smov [#allocation13]   ;;  %s311_s14 = int_to_ptr.vmem [resolvable:$true] %s310_s14 }
  0x1b   : > { %p4059_p6 = pnand %p3087_p3, %p285_p5  ;;  %s342_s16 = sshll.u32 %s3936_s15, 4  ;;  %s4071_s16 = int_to_ptr.vmem [resolvable:$true] %s342_s16 }
  0x1c   : > { %s4958_s2 = sld [smem:[#allocation32_spill]] }
  0x1d   : > { %s4956_s12 = scalar_select %p4059_p6, 1, 0 }
  0x1e   : > { %p3369_p7 = pneg %p4059_p6 }
  0x20   : > { %p4067_p8 = pnand %p3369_p7, %p4920_p4 }
  0x22   : > { %s4957_s17 = scalar_select %p4067_p8, 1, 0 }
  0x23   : > { %s3680_s20 = scalar_lea.hbm %s4958_s2, 1024  ;;  %p4081_p10 = pneg %p4067_p8 }
  0x24   : > { %p3681_p9 = scmp.ne.s32.totalorder %s4958_s2, %s3680_s20  ;;  %p3687_p13 = scmp.lt.u32.totalorder %s3680_s20, %s4958_s2 }
  0x26   : > { %p3683_p11 = pnand %p4081_p10, %p3681_p9 }
  0x28   : > { %p3684_p12 = pneg %p3683_p11 }
  0x2a   : > { %p3689_p0 = pnand %p3687_p13, %p3684_p12 }
  0x2c   : > { %3692 = shalt.err (!%p3689_p0)
}
  0x2d   : > { %s3693_s26 = scalar_lea.vmem %s311_s14, 1024  ;;  %p3701_p5 = scmp.lt.s32.totalorder %s311_s14, %s311_s14 }
  0x2e   : > { %p3694_p1 = scmp.ne.s32.totalorder %s311_s14, %s3693_s26  ;;  %p3702_p7 = scmp.lt.s32.totalorder %s3693_s26, %s3693_s26 }
  0x30   : > { %p3696_p2 = pnand %p3694_p1, %p4081_p10  ;;  %p3703_p4 = por %p3702_p7, %p3701_p5 }
  0x32   : > { %p3697_p3 = pneg %p3696_p2 }
  0x34   : > { %p3704_p6 = pnand %p3703_p4, %p3697_p3 }
  0x36   : > { %3707 = shalt.err (!%p3704_p6)
}
  0x37   : > { %s4922_s13 = smov 128   ;;  %s4924_s15 = smov 8  }
  0x38   : > { %3375 = dma.hbm_to_vmem [thread:$0]  (!%p4067_p8), %s4958_s2, 1024, %s311_s14, [#allocation8], %s4922_s13, %s4922_s13, %s4924_s15  }
  0x39   : > { %s4960_s8 = sld [smem:[#allocation36_spill]] }
  0x3f   : > { %s3708_s22 = scalar_lea.hbm %s4960_s8, 128 }
  0x40   : > { %p3709_p4 = scmp.ne.s32.totalorder %s4960_s8, %s3708_s22  ;;  %p3715_p11 = scmp.lt.u32.totalorder %s3708_s22, %s4960_s8 }
  0x42   : > { %p3711_p6 = pnand %p3709_p4, %p4081_p10 }
  0x44   : > { %p3712_p9 = pneg %p3711_p6 }
  0x46   : > { %p3717_p12 = pnand %p3715_p11, %p3712_p9 }
  0x48   : > { %3720 = shalt.err (!%p3717_p12)
}
  0x49   : > { %s3721_s14 = scalar_lea.vmem %s4071_s16, 128  ;;  %p3729_p2 = scmp.lt.s32.totalorder %s4071_s16, %s4071_s16 }
  0x4a   : > { %p3722_p13 = scmp.ne.s32.totalorder %s4071_s16, %s3721_s14  ;;  %p3730_p3 = scmp.lt.s32.totalorder %s3721_s14, %s3721_s14 }
  0x4c   : > { %p3724_p0 = pnand %p3722_p13, %p4081_p10  ;;  %p3731_p5 = por %p3730_p3, %p3729_p2 }
  0x4e   : > { %p3725_p1 = pneg %p3724_p0 }
  0x50   : > { %p3732_p7 = pnand %p3731_p5, %p3725_p1 }
  0x52   : > { %3735 = shalt.err (!%p3732_p7)
}
  0x53   : > { %s4926_s18 = smov 64   ;;  %s4928_s11 = smov 4  }
  0x54   : > { %3381 = dma.hbm_to_vmem [thread:$0]  (!%p4067_p8), %s4960_s8, 128, %s4071_s16, [#allocation14], %s4926_s18, %s4926_s18, %s4928_s11  }
  0x55   : > { %s3086_s21 = sadd.s32 4294967294, %s3932_s30   ;;  %s4128_s22 = sadd.s32 1, %s3932_s30  }
  0x56   : > { %4961 = sst [smem:[#allocation28_spill]] %s4128_s22  ;;  %s101_s24 = ssub.s32 %s3932_s30, %s4128_s22 }
  0x57   : > { %s104_s25 = sadd.s32 1, %s3928_s29  ;;  %p102_p4 = scmp.eq.s32.totalorder %s101_s24, 0 }
  0x58   : > { %p111_p6 = scmp.ne.s32.totalorder %s3928_s29, %s3924_s28  ;;  %p112_p9 = scmp.eq.s32.totalorder %s3932_s30, 0 }
  0x59   : > { %p117_p11 = scmp.ne.s32.totalorder %s3924_s28, %s3920_s27  ;;  %p4964_p13 = scmp.eq.s32.totalorder %s4054_s0, 0 }
  0x5a   : > { %s4139_s26 = scalar_select %p102_p4, %s3928_s29, %s104_s25  }
  0x5b   : > { %p4141_p12 = por %p112_p9, %p111_p6  ;;  %p4147_p0 = por %p4964_p13, %p117_p11 }
  0x5c   : > { %4962 = sst [smem:[#allocation29_spill]] %s4139_s26  ;;  %p272_p1 = scmp.eq.s32.totalorder %s4054_s0, 3 }
  0x5d   : > { %s4965_s16 = scalar_select %p4147_p0, 1, 0 }
  0x5e   : > { %p278_p2 = scmp.eq.s32.totalorder %s3086_s21, 3  ;;  %p3401_p3 = scmp.lt.s32.totalorder %s3932_s30, 4 }
  0x5f   : > { %s372_s19 = sand.u32 1, %s3932_s30   ;;  %p4154_p5 = por %p272_p1, %p111_p6 }
  0x60   : > { %p4158_p7 = por %p278_p2, %p117_p11  ;;  %s374_s25 = sand.u32 1, %s3928_s29  }
  0x61   : > { %s4966_s20 = scalar_select %p4154_p5, 1, 0 }
  0x62   : > { %s4968_s24 = scalar_select %p4158_p7, 1, 0 }
  0x63   : > { %4967 = sst [smem:[#allocation30_spill]] %s4966_s20  ;;  %s4163_s13 = sshll.u32 %s374_s25, 5 }
  0x64   : > { %4969 = sst [smem:[#allocation31_spill]] %s4968_s24  ;;  %s3168_s15 = sshll.u32 %s3932_s30, 9 }
  0x65   : > { %s4970_s4 = sld [smem:[#allocation33_spill]]  ;;  %s376_s21 = scalar_lea.vmem [#allocation10], %s4163_s13 }
  0x66   : > { %s383_s8 = sshll.u32 %s376_s21, 4  ;;  %p4174_p4 = pnand %p3401_p3, %p4141_p12  ;;  %s4178_s8 = int_to_ptr.vmem [resolvable:$true] %s383_s8 }
  0x67   : > { %s4183_s18 = scalar_lea.hbm %s4913_s5, %s3168_s15  ;;  %s4185_s11 = scalar_lea.sflag [#allocation11], %s372_s19 }
  0x68   : > { %s4971_s26 = scalar_select %p4174_p4, 1, 0 }
  0x69   : > { %p4942_p9 = pneg %p4174_p4 }
  0x6b   : > { %s4169_s2 = scalar_lea.hbm %s4970_s4, %s3168_s15  ;;  %s3741_s24 = scalar_lea.hbm %s4970_s4, 2048 }
  0x6c   : > { %s3736_s22 = scalar_lea.hbm %s4169_s2, 512  ;;  %p3742_p13 = scmp.lt.u32.totalorder %s4169_s2, %s4970_s4 }
  0x6d   : > { %p3737_p6 = scmp.ne.s32.totalorder %s4169_s2, %s3736_s22  ;;  %p3743_p1 = scmp.lt.u32.totalorder %s3741_s24, %s3736_s22 }
  0x6e   : > { %p3745_p3 = scmp.lt.u32.totalorder %s3736_s22, %s4169_s2 }
  0x6f   : > { %p3739_p11 = pnand %p4942_p9, %p3737_p6  ;;  %p3744_p2 = por %p3743_p1, %p3742_p13 }
  0x71   : > { %p3740_p12 = pneg %p3739_p11  ;;  %p3746_p7 = por %p3745_p3, %p3744_p2 }
  0x73   : > { %p3747_p5 = pnand %p3746_p7, %p3740_p12 }
  0x75   : > { %3750 = shalt.err (!%p3747_p5)
}
  0x76   : > { %s3751_s29 = scalar_lea.vmem %s4178_s8, 512  ;;  %s3941_s15 = smov [#allocation10]  }
  0x77   : > { %p3752_p6 = scmp.ne.s32.totalorder %s4178_s8, %s3751_s29  ;;  %s3756_s19 = sshll.u32 %s3941_s15, 4  ;;  %s3757_s19 = int_to_ptr.vmem [resolvable:$false] %s3756_s19 }
  0x78   : > { %s3758_s27 = scalar_lea.vmem %s3757_s19, 1024  ;;  %p3759_p8 = scmp.lt.s32.totalorder %s4178_s8, %s3757_s19 }
  0x79   : > { %p3754_p11 = pnand %p3752_p6, %p4942_p9  ;;  %p3760_p13 = scmp.lt.s32.totalorder %s3758_s27, %s3751_s29 }
  0x7b   : > { %p3755_p0 = pneg %p3754_p11  ;;  %p3761_p1 = por %p3760_p13, %p3759_p8 }
  0x7d   : > { %p3762_p2 = pnand %p3761_p1, %p3755_p0 }
  0x7f   : > { %3765 = shalt.err (!%p3762_p2)
}
  0x80   : > { %s4972_s30 = smov 4   ;;  %s4973_s22 = smov 64  }
  0x81   : > { %3388 = dma.hbm_to_vmem [thread:$0]  (!%p4174_p4), %s4169_s2, 512, %s4178_s8, %s4185_s11, %s4973_s22, %s4973_s22, %s4972_s30  }
  0x82   : > { %s397_s24 = scalar_lea.vmem [#allocation12], %s4163_s13  ;;  %s3942_s14 = smov [#allocation4]  }
  0x83   : > { %s404_s25 = sshll.u32 %s397_s24, 4  ;;  %s297_s21 = sshll.u32 %s3942_s14, 4  ;;  %s4217_s25 = int_to_ptr.vmem [resolvable:$true] %s404_s25  ;;  %s298_s21 = int_to_ptr.vmem [resolvable:$true] %s297_s21 }
  0x84   : > { %s3766_s19 = scalar_lea.hbm %s4909_s1, 1024 }
  0x85   : > { %p3767_p8 = scmp.ne.s32.totalorder %s4909_s1, %s3766_s19  ;;  %p3773_p7 = scmp.lt.u32.totalorder %s3766_s19, %s4909_s1 }
  0x87   : > { %p3769_p0 = pnand %p3767_p8, %p4081_p10 }
  0x89   : > { %p3770_p5 = pneg %p3769_p0 }
  0x8b   : > { %p3775_p12 = pnand %p3773_p7, %p3770_p5 }
  0x8d   : > { %3778 = shalt.err (!%p3775_p12)
}
  0x8e   : > { %s3779_s8 = scalar_lea.vmem %s298_s21, 1024  ;;  %p3787_p13 = scmp.lt.s32.totalorder %s298_s21, %s298_s21 }
  0x8f   : > { %p3780_p3 = scmp.ne.s32.totalorder %s298_s21, %s3779_s8  ;;  %p3788_p1 = scmp.lt.s32.totalorder %s3779_s8, %s3779_s8 }
  0x91   : > { %p3782_p6 = pnand %p3780_p3, %p4081_p10  ;;  %p3789_p2 = por %p3788_p1, %p3787_p13 }
  0x93   : > { %p3783_p11 = pneg %p3782_p6 }
  0x95   : > { %p3790_p9 = pnand %p3789_p2, %p3783_p11 }
  0x97   : > { %3793 = shalt.err (!%p3790_p9)
}
  0x98   : > { %p4974_p8 = scmp.ne.s32.totalorder %s4957_s17, 0  ;;  %s4975_s4 = smov 8  }
  0x99   : > { %s4976_s13 = smov 128   ;;  %s3943_s14 = smov [#allocation9]  }
  0x9a   : > { %3372 = dma.hbm_to_vmem [thread:$0]  (!%p4974_p8), %s4909_s1, 1024, %s298_s21, [#allocation5], %s4976_s13, %s4976_s13, %s4975_s4  }
  0x9b   : > { %s323_s29 = sshll.u32 %s3943_s14, 4  ;;  %s3944_s15 = smov [#allocation15]   ;;  %s324_s29 = int_to_ptr.vmem [resolvable:$true] %s323_s29 }
  0x9c   : > { %s358_s19 = sshll.u32 %s3944_s15, 4  ;;  %s3794_s8 = scalar_lea.hbm %s4911_s3, 1024  ;;  %s359_s19 = int_to_ptr.vmem [resolvable:$true] %s358_s19 }
  0x9d   : > { %p3795_p9 = scmp.ne.s32.totalorder %s4911_s3, %s3794_s8  ;;  %p3801_p7 = scmp.lt.u32.totalorder %s3794_s8, %s4911_s3 }
  0x9f   : > { %p3797_p0 = pnand %p3795_p9, %p4081_p10 }
  0xa1   : > { %p3798_p5 = pneg %p3797_p0 }
  0xa3   : > { %p3803_p12 = pnand %p3801_p7, %p3798_p5 }
  0xa5   : > { %3806 = shalt.err (!%p3803_p12)
}
  0xa6   : > { %s3807_s21 = scalar_lea.vmem %s324_s29, 1024  ;;  %p3815_p13 = scmp.lt.s32.totalorder %s324_s29, %s324_s29 }
  0xa7   : > { %p3808_p3 = scmp.ne.s32.totalorder %s324_s29, %s3807_s21  ;;  %p3816_p1 = scmp.lt.s32.totalorder %s3807_s21, %s3807_s21 }
  0xa9   : > { %p3810_p6 = pnand %p3808_p3, %p4081_p10  ;;  %p3817_p2 = por %p3816_p1, %p3815_p13 }
  0xab   : > { %p3811_p11 = pneg %p3810_p6 }
  0xad   : > { %p3818_p4 = pnand %p3817_p2, %p3811_p11 }
  0xaf   : > { %3821 = shalt.err (!%p3818_p4)
}
  0xb0   : > { %3378 = dma.hbm_to_vmem [thread:$0]  (!%p4974_p8), %s4911_s3, 1024, %s324_s29, [#allocation8], %s4976_s13, %s4976_s13, %s4975_s4  }
  0xb1   : > { %s3822_s14 = scalar_lea.hbm %s4918_s10, 128 }
  0xb2   : > { %p3823_p9 = scmp.ne.s32.totalorder %s4918_s10, %s3822_s14  ;;  %p3829_p5 = scmp.lt.u32.totalorder %s3822_s14, %s4918_s10 }
  0xb4   : > { %p3825_p4 = pnand %p3823_p9, %p4081_p10 }
  0xb6   : > { %p3826_p0 = pneg %p3825_p4 }
  0xb8   : > { %p3831_p7 = pnand %p3829_p5, %p3826_p0 }
  0xba   : > { %3834 = shalt.err (!%p3831_p7)
}
  0xbb   : > { %s3835_s20 = scalar_lea.vmem %s359_s19, 128  ;;  %p3843_p11 = scmp.lt.s32.totalorder %s359_s19, %s359_s19 }
  0xbc   : > { %p3836_p12 = scmp.ne.s32.totalorder %s359_s19, %s3835_s20  ;;  %p3844_p13 = scmp.lt.s32.totalorder %s3835_s20, %s3835_s20 }
  0xbe   : > { %p3838_p3 = pnand %p3836_p12, %p4081_p10  ;;  %p3845_p1 = por %p3844_p13, %p3843_p11 }
  0xc0   : > { %p3839_p6 = pneg %p3838_p3 }
  0xc2   : > { %p3846_p2 = pnand %p3845_p1, %p3839_p6 }
  0xc4   : > { %3849 = shalt.err (!%p3846_p2)
}
  0xc5   : > { %3384 = dma.hbm_to_vmem [thread:$0]  (!%p4974_p8), %s4918_s10, 128, %s359_s19, [#allocation14], %s4973_s22, %s4973_s22, %s4972_s30  }
  0xc6   : > { %s3850_s23 = scalar_lea.hbm %s4183_s18, 512  ;;  %p4977_p9 = scmp.ne.s32.totalorder %s4971_s26, 0 }
  0xc7   : > { %p3851_p10 = scmp.ne.s32.totalorder %s4183_s18, %s3850_s23  ;;  %s3855_s21 = scalar_lea.hbm %s4913_s5, 2048 }
  0xc8   : > { %p4978_p4 = pneg %p4977_p9  ;;  %p3856_p7 = scmp.lt.u32.totalorder %s4183_s18, %s4913_s5 }
  0xc9   : > { %p3857_p12 = scmp.lt.u32.totalorder %s3855_s21, %s3850_s23  ;;  %p3859_p6 = scmp.lt.u32.totalorder %s3850_s23, %s4183_s18 }
  0xca   : > { %p3853_p0 = pnand %p3851_p10, %p4978_p4 }
  0xcb   : > { %p3858_p3 = por %p3857_p12, %p3856_p7 }
  0xcc   : > { %p3854_p5 = pneg %p3853_p0 }
  0xcd   : > { %p3860_p11 = por %p3859_p6, %p3858_p3 }
  0xcf   : > { %p3861_p13 = pnand %p3860_p11, %p3854_p5 }
  0xd1   : > { %3864 = shalt.err (!%p3861_p13)
}
  0xd2   : > { %s3865_s19 = scalar_lea.vmem %s4217_s25, 512  ;;  %p4979_p1 = pmov %p4978_p4 }
  0xd3   : > { %p3866_p8 = scmp.ne.s32.totalorder %s4217_s25, %s3865_s19  ;;  %s3945_s9 = smov [#allocation12]  }
  0xd4   : > { %s3870_s24 = sshll.u32 %s3945_s9, 4  ;;  %s3871_s24 = int_to_ptr.vmem [resolvable:$false] %s3870_s24 }
  0xd5   : > { %p3868_p2 = pnand %p3866_p8, %p4979_p1  ;;  %s3872_s14 = scalar_lea.vmem %s3871_s24, 1024 }
  0xd6   : > { %p3873_p4 = scmp.lt.s32.totalorder %s4217_s25, %s3871_s24  ;;  %p3874_p0 = scmp.lt.s32.totalorder %s3872_s14, %s3865_s19 }
  0xd7   : > { %p3869_p10 = pneg %p3868_p2 }
  0xd8   : > { %p3875_p7 = por %p3874_p0, %p3873_p4 }
  0xda   : > { %p3876_p12 = pnand %p3875_p7, %p3869_p10 }
  0xdc   : > { %3879 = shalt.err (!%p3876_p12)
}
  0xdd   : > { %3391 = dma.hbm_to_vmem [thread:$0]  (!%p4977_p9), %s4183_s18, 512, %s4217_s25, %s4185_s11, %s4973_s22, %s4973_s22, %s4972_s30  }
  0xde   : > { %p4980_p5 = scmp.ne.s32.totalorder %s4956_s12, 0 }
  0xdf   : > { %p4981_p3 = scmp.eq.s32.totalorder (!%p4980_p5), %s4054_s0, 0 }
  0xe0   : > { %416 = sbr.rel (%p4980_p5) target bundleno = 2595 (0xa23), region = 60 }
  0xe7   : > { %3899 = dma.done.wait (%p4981_p3), [#allocation5], 1024   ;;  %p4982_p6 = pmov %p4981_p3 }
  0xe8   : > { %p4983_p11 = pmov %p4981_p3 }
  0xe9   : > { %3901 = vsyncadd (%p4982_p6), [#allocation5], 4294966272 }
  0xea   : > { %3903 = dma.done.wait (%p4983_p11), [#allocation8], 2048   ;;  %p4984_p13 = pmov %p4981_p3 }
  0xeb   : > { %s430_s26 = sand.u32 1, %s4054_s0   ;;  %s432_s18 = sand.u32 1, %s3924_s28  }
  0xec   : > { %3905 = vsyncadd (%p4984_p13), [#allocation8], 4294965248  ;;  %s4323_s12 = sshll.u32 %s432_s18, 5  ;;  %s431_s11 = scalar_lea.sflag [#allocation11], %s430_s26 }
  0xed   : > { %s4326_s30 = scalar_lea.vmem [#allocation10], %s4323_s12  ;;  %p4985_p9 = scmp.ne.s32.totalorder %s4965_s16, 0 }
  0xef   : > { %3907 = dma.done.wait (%p4985_p9), %s431_s11, 1024  }
  0xf0   : > { %3909 = vsyncadd (%p4985_p9), %s431_s11, 4294966272  ;;  %s4333_s22 = scalar_lea.vmem [#allocation12], %s4323_s12  ;;  %p4986_p8 = pmov %p4981_p3 }
  0xf1   : > { %p4987_p1 = pmov %p4981_p3 }
  0xf2   : > { %3911 = dma.done.wait (%p4986_p8), [#allocation14], 256  }
  0xf3   : > { %3913 = vsyncadd (%p4987_p1), [#allocation14], 4294967040  ;;  %s494_s25 = sld [smem:[#allocation3 + %s4054_s0]]  ;;  %v501_v1 = vld [vmem:[#allocation4 + $0x20] sm:$0xff]  ;;  %v502_v2 = vld [vmem:[#allocation4 + $0x28] sm:$0xff]  ;;  %s3952_s20 = smov 16  }
  0xf4   : > { %s4988_s2 = sld [smem:[#allocation35_spill]]  ;;  %v3946_v28 = vmov 683565275   ;;  %v3947_v30 = vmov 2475754826   ;;  %s3953_s4 = smov 112  }
  0xf5   : > { %v3948_v32 = vmov 2131351028   ;;  %v3949_v34 = vmov 2102212464   ;;  %v3950_v36 = vmov 920167782  }
  0xf6   : > { %v3951_v44 = vmov 1326507024   ;;  %s4989_s29 = sld [smem:[#allocation34_spill]]  ;;  %s4991_s9 = sld [smem:[#allocation37_spill]] }
  0xf7   : > { %s492_s24 = scalar_lea.vmem [#allocation16], %s4323_s12  ;;  %s2901_s14 = scalar_lea.sflag [#allocation6], %s432_s18 }
  0xf9   : > { %s506_s8 = ssub.f32 0.0, %s494_s25 }
  0xfa   : > { %v3638_v0 = vld [vmem:[%s4988_s2] sm:$0xff]  }
  0xfb   : > { %3259 = vmatprep.subr.bf16.mxu1 %v3638_v0  ;;  %s507_s16 = smul.f32 0.001, %s506_s8  ;;  %3249 = vmatprep.subr.bf16.mxu0 %v3638_v0 }
  0xfc   : > { %3260 = vmatpush3.bf16.msra.mxu1 %v3638_v0  ;;  %3250 = vmatpush3.bf16.msra.mxu0 %v3638_v0  ;;  %s4990_s17 = smov %s4989_s29 }
  0xfd   : > { %v4343_v3 = vstv %s507_s16 }
  0xfe   : > { %v4346_v4 = vmul.f32 %v4343_v3, %v501_v1  ;;  %v4349_v5 = vmul.f32 %v4343_v3, %v502_v2 }
 0x100   : > { %v517_v6 = vand.u32 2147483647, %v4346_v4  ;;  %v520_v7 = vand.u32 2139095040, %v4346_v4  ;;  %v620_v8 = vand.u32 2147483647, %v4349_v5  ;;  %v623_v9 = vand.u32 2139095040, %v4349_v5 }
 0x101   : > { %vm519_vm14 = vcmp.lt.s32.totalorder %v4346_v4, 0 }
 0x102   : > { %v521_v10 = vshrl.u32 %v520_v7, 23  ;;  %v524_v11 = vand.u32 8388607, %v517_v6  ;;  %v624_v12 = vshrl.u32 %v623_v9, 23  ;;  %v627_v13 = vand.u32 8388607, %v620_v8 }
 0x103   : > { %vm518_vm15 = vcmp.le.f32.partialorder %v517_v6, 0.7853982 }
 0x104   : > { %v3109_v14 = vadd.s32 4294967169, %v521_v10  ;;  %v3113_v15 = vadd.s32 4294967169, %v624_v12  ;;  %v525_v17 = vor.u32 8388608, %v524_v11  ;;  %v628_v18 = vor.u32 8388608, %v627_v13 }
 0x106   : > { %v527_v16 = vadd.s32 1, %v3109_v14  ;;  %v630_v19 = vadd.s32 1, %v3113_v15  ;;  %v4359_v24 = vshll.u32 %v525_v17, 8  ;;  %v4361_v26 = vshll.u32 %v628_v18, 8 }
 0x108   : > { %vm528_vm0 = vcmp.gt.s32.totalorder %v527_v16, 0  ;;  %vm631_vm1 = vcmp.gt.s32.totalorder %v630_v19, 0 }
 0x109   : > { %v529_v20 = vsel %vm528_vm0, %v527_v16, 0  ;;  %v632_v23 = vsel %vm631_vm1, %v630_v19, 0  ;;  %vm622_vm0 = vcmp.lt.s32.totalorder %v4349_v5, 0  ;;  %vm621_vm1 = vcmp.le.f32.partialorder %v620_v8, 0.7853982 }
 0x10a   : > { %v530_v21 = vshrl.u32 %v529_v20, 5  ;;  %v531_v22 = vand.u32 31, %v529_v20  ;;  %v634_v25 = vand.u32 31, %v632_v23  ;;  %v4363_v38 = vshrl.u32 %v632_v23, 5 }
 0x10c   : > { %v532_v27 = vsub.s32 32, %v531_v22  ;;  %v534_v29 = vshll.u32 %v3946_v28, %v531_v22  ;;  %v537_v31 = vshll.u32 %v3947_v30, %v531_v22  ;;  %v540_v33 = vshll.u32 %v3948_v32, %v531_v22 }
 0x10d   : > { %v543_v35 = vshll.u32 %v3949_v34, %v531_v22  ;;  %v546_v37 = vshll.u32 %v3950_v36, %v531_v22  ;;  %vm549_vm2 = vcmp.lt.s32.totalorder %v530_v21, 1  ;;  %vm550_vm3 = vcmp.lt.s32.totalorder %v530_v21, 2 }
 0x10e   : > { %v533_v39 = vshrl.u32 %v3946_v28, %v532_v27  ;;  %v535_v40 = vshrl.u32 %v3947_v30, %v532_v27  ;;  %v538_v41 = vshrl.u32 %v3948_v32, %v532_v27  ;;  %v541_v42 = vshrl.u32 %v3949_v34, %v532_v27 }
 0x10f   : > { %v544_v43 = vshrl.u32 %v3950_v36, %v532_v27  ;;  %v547_v45 = vshrl.u32 %v3951_v44, %v532_v27  ;;  %vm552_vm4 = vcmp.lt.s32.totalorder %v530_v21, 4  ;;  %v635_v49 = vsub.s32 32, %v634_v25 }
 0x110   : > { %v536_v46 = vor.u32 %v535_v40, %v534_v29  ;;  %v539_v47 = vor.u32 %v538_v41, %v537_v31  ;;  %v542_v48 = vor.u32 %v541_v42, %v540_v33  ;;  %vm551_vm5 = vcmp.lt.s32.totalorder %v530_v21, 3 }
 0x111   : > { %v545_v50 = vor.u32 %v544_v43, %v543_v35  ;;  %v548_v51 = vor.u32 %v547_v45, %v546_v37  ;;  %v637_v52 = vshll.u32 %v3946_v28, %v634_v25  ;;  %v640_v60 = vshll.u32 %v3947_v30, %v634_v25 }
 0x112   : > { %v553_v53 = vsel %vm549_vm2, %v533_v39, %v536_v46  ;;  %v554_v54 = vsel %vm552_vm4, %v542_v48, 2102212464  ;;  %v557_v55 = vsel %vm549_vm2, %v536_v46, %v539_v47  ;;  %v561_v56 = vsel %vm549_vm2, %v539_v47, %v542_v48 }
 0x113   : > { %v555_v57 = vsel %vm551_vm5, %v539_v47, %v554_v54  ;;  %v558_v58 = vsel %vm552_vm4, %v545_v50, 920167782  ;;  %v562_v59 = vsel %vm552_vm4, %v548_v51, 1326507024  ;;  %v636_v63 = vshrl.u32 %v3946_v28, %v635_v49 }
 0x114   : > { %v559_v61 = vsel %vm551_vm5, %v542_v48, %v558_v58  ;;  %v563_v62 = vsel %vm551_vm5, %v545_v50, %v562_v59  ;;  %v638_v0 = vshrl.u32 %v3947_v30, %v635_v49  ;;  %v556_v1 = vsel %vm550_vm3, %v553_v53, %v555_v57 }
 0x115   : > { %v560_v2 = vsel %vm550_vm3, %v557_v55, %v559_v61  ;;  %v564_v7 = vsel %vm550_vm3, %v561_v56, %v563_v62  ;;  %v641_v9 = vshrl.u32 %v3948_v32, %v635_v49  ;;  %v643_v16 = vshll.u32 %v3948_v32, %v634_v25 }
 0x116   : > { %v4372_v10 = vmul.u32.u64.low %v4359_v24, %v564_v7  ;;  %v4373_v11 = vmul.u32.u64.high %v4359_v24, %v564_v7, %v4372_v10  ;;  %v4376_v12 = vmul.u32.u64.low %v4359_v24, %v560_v2  ;;  %v4377_v13 = vmul.u32.u64.high %v4359_v24, %v560_v2, %v4376_v12 }
 0x117   : > { %v639_v14 = vor.u32 %v638_v0, %v637_v52  ;;  %v642_v15 = vor.u32 %v641_v9, %v640_v60  ;;  %v644_v17 = vshrl.u32 %v3949_v34, %v635_v49  ;;  %v646_v18 = vshll.u32 %v3949_v34, %v634_v25 }
 0x118   : > { %v647_v19 = vshrl.u32 %v3950_v36, %v635_v49  ;;  %v649_v20 = vshll.u32 %v3950_v36, %v634_v25  ;;  %v650_v22 = vshrl.u32 %v3951_v44, %v635_v49  ;;  %v572_v21 = vmul.u32 %v4359_v24, %v556_v1 }
 0x119   : > { %v645_v23 = vor.u32 %v644_v17, %v643_v16  ;;  %vm652_vm6 = vcmp.lt.s32.totalorder %v4363_v38, 1  ;;  %vm653_vm7 = vcmp.lt.s32.totalorder %v4363_v38, 2  ;;  %vm574_vm8 = vc.u32 %v4373_v11, %v4376_v12 }
 0x11a   : > { %v575_v27 = vadd.s32 1, %v4377_v13  ;;  %v648_v28 = vor.u32 %v647_v19, %v646_v18  ;;  %vm654_vm9 = vcmp.lt.s32.totalorder %v4363_v38, 3  ;;  %v651_v29 = vor.u32 %v650_v22, %v649_v20 }
 0x11b   : > { %vm655_vm10 = vcmp.lt.s32.totalorder %v4363_v38, 4  ;;  %v656_v30 = vsel %vm652_vm6, %v636_v63, %v639_v14  ;;  %v660_v25 = vsel %vm652_vm6, %v639_v14, %v642_v15  ;;  %v664_v33 = vsel %vm652_vm6, %v642_v15, %v645_v23 }
 0x11c   : > { %v576_v31 = vsel %vm574_vm8, %v575_v27, %v4377_v13  ;;  %v657_v24 = vsel %vm655_vm10, %v645_v23, 2102212464  ;;  %v661_v32 = vsel %vm655_vm10, %v648_v28, 920167782  ;;  %v665_v37 = vsel %vm655_vm10, %v651_v29, 1326507024 }
 0x11d   : > { %v577_v34 = vadd.s32 %v576_v31, %v572_v21  ;;  %v658_v35 = vsel %vm654_vm9, %v642_v15, %v657_v24  ;;  %v662_v36 = vsel %vm654_vm9, %v645_v23, %v661_v32  ;;  %v666_v41 = vsel %vm654_vm9, %v648_v28, %v665_v37  ;;  %v495_v13 = vld [vmem:[#allocation4] sm:$0xff]  ;;  %v496_v29 = vld [vmem:[#allocation4 + $0x8] sm:$0xff] }
 0x11e   : > { %v659_v39 = vsel %vm653_vm7, %v656_v30, %v658_v35  ;;  %v663_v40 = vsel %vm653_vm7, %v660_v25, %v662_v36  ;;  %v667_v43 = vsel %vm653_vm7, %v664_v33, %v666_v41  ;;  %v573_v62 = vadd.s32 %v4376_v12, %v4373_v11 }
 0x11f   : > { %v578_v42 = vadd.s32 536870912, %v577_v34  ;;  %v4394_v44 = vmul.u32.u64.low %v4361_v26, %v663_v40  ;;  %v4395_v45 = vmul.u32.u64.high %v4361_v26, %v663_v40, %v4394_v44  ;;  %v675_v49 = vmul.u32 %v4361_v26, %v659_v39 }
 0x120   : > { %v4398_v46 = vmul.u32.u64.low %v4361_v26, %v667_v43  ;;  %v4399_v47 = vmul.u32.u64.high %v4361_v26, %v667_v43, %v4398_v46  ;;  %v509_v18 = vmul.f32 %v4343_v3, %v495_v13  ;;  %vm609_vm6 = vweird.f32 %v4346_v4 }
 0x121   : > { %v579_v48 = vshrl.u32 %v578_v42, 30  ;;  %v678_v51 = vadd.s32 1, %v4395_v45  ;;  %vm712_vm9 = vweird.f32 %v4349_v5 }
 0x122   : > { %vm677_vm11 = vc.u32 %v4399_v47, %v4394_v44  ;;  %v676_v11 = vadd.s32 %v4394_v44, %v4399_v47  ;;  %v511_v30 = vmul.f32 1.442695, %v509_v18 }
 0x123   : > { %v580_v50 = vshll.u32 %v579_v48, 30  ;;  %v679_v38 = vsel %vm677_vm11, %v678_v51, %v4395_v45  ;;  %v603_v22 = vsub.s32 4, %v579_v48 }
 0x124   : > { %v680_v53 = vadd.s32 %v679_v38, %v675_v49  ;;  %3642 = vpow2.f32 %v511_v30  ;;  %v965_v30 = vld [vmem:[#allocation9 + $0x10] sm:$0xff] }
 0x125   : > { %v581_v52 = vsub.s32 %v577_v34, %v580_v50  ;;  %v604_v33 = vsel %vm519_vm14, %v603_v22, %v579_v48  ;;  %v510_v34 = vmul.f32 %v4343_v3, %v496_v29 }
 0x126   : > { %v681_v55 = vadd.s32 536870912, %v680_v53  ;;  %v606_v40 = vsel %vm518_vm15, 0, %v604_v33  ;;  %v957_v33 = vld [vmem:[#allocation7 + $0x10] sm:$0xff] }
 0x127   : > { %v583_v54 = vsub.s32 0, %v581_v52  ;;  %v513_v43 = vmul.f32 1.442695, %v510_v34  ;;  %v816_v46 = vadd.s32 3, %v606_v40  ;;  %v610_v48 = vand.u32 3, %v606_v40  ;;  %v967_v34 = vld [vmem:[#allocation9 + $0x20] sm:$0xff] }
 0x128   : > { %v682_v57 = vshrl.u32 %v681_v55, 30  ;;  %v504_v55 = vld [vmem:[#allocation4 + $0x30] sm:$0xff] }
 0x129   : > { %v3110_v56 = vmin.u32 %v583_v54, %v581_v52  ;;  %v817_v49 = vand.u32 3, %v816_v46  ;;  %v498_v54 = vld [vmem:[#allocation4 + $0x10] sm:$0xff]  ;;  %vm615_vm2 = vcmp.eq.s32.totalorder %v610_v48, 2  ;;  %vm612_vm4 = vcmp.eq.s32.totalorder %v610_v48, 0 }
 0x12a   : > { %v683_v59 = vshll.u32 %v682_v57, 30  ;;  %v706_v45 = vsub.s32 4, %v682_v57  ;;  %vm611_vm7 = vcmp.lt.s32.totalorder %v610_v48, 2 }
 0x12b   : > { %v585_v58 = vclz %v3110_v56  ;;  %vm822_vm3 = vcmp.eq.s32.totalorder %v817_v49, 2  ;;  %vm819_vm5 = vcmp.eq.s32.totalorder %v817_v49, 0  ;;  %vm818_vm8 = vcmp.lt.s32.totalorder %v817_v49, 2 }
 0x12c   : > { %v684_v61 = vsub.s32 %v680_v53, %v683_v59  ;;  %v707_v47 = vsel %vm622_vm0, %v706_v45, %v682_v57  ;;  %v4436_v45 = vld [vmem:[#allocation9 + $0x30] sm:$0xff] }
 0x12d   : > { %v3111_v60 = vadd.s32 4294967294, %v585_v58  ;;  %v709_v38 = vsel %vm621_vm1, 0, %v707_v47 }
 0x12e   : > { %v686_v63 = vsub.s32 0, %v684_v61  ;;  %v3643_v51 = vpop.eup %3642  ;;  %v920_v8 = vadd.s32 3, %v709_v38 }
 0x12f   : > { %vm3112_vm12 = vcmp.lt.s32.totalorder %v3111_v60, 0 }
 0x130   : > { %v588_v26 = vsel %vm3112_vm12, 0, %v3111_v60  ;;  %v3114_v7 = vmin.u32 %v686_v63, %v684_v61  ;;  %v921_v13 = vand.u32 3, %v920_v8 }
 0x131   : > { %v589_v0 = vsub.s32 32, %v588_v26  ;;  %v590_v1 = vshll.u32 %v581_v52, %v588_v26  ;;  %v593_v2 = vsub.s32 4294967266, %v588_v26 }
 0x132   : > { %v688_v14 = vclz %v3114_v7  ;;  %vm926_vm11 = vcmp.eq.s32.totalorder %v921_v13, 2 }
 0x133   : > { %v591_v9 = vshrl.u32 %v573_v62, %v589_v0  ;;  %v594_v10 = vadd.s32 127, %v593_v2  ;;  %v935_v62 = vmul.f32 %v3643_v51, %v504_v55  ;;  %v505_v2 = vld [vmem:[#allocation4 + $0x38] sm:$0xff] }
 0x134   : > { %v3115_v17 = vadd.s32 4294967294, %v688_v14 }
 0x135   : > { %v592_v15 = vor.u32 %v591_v9, %v590_v1  ;;  %v595_v16 = vshll.u32 %v594_v10, 23  ;;  %v499_v1 = vld [vmem:[#allocation4 + $0x18] sm:$0xff]  ;;  %v713_v9 = vand.u32 3, %v709_v38 }
 0x136   : > { %vm3116_vm13 = vcmp.lt.s32.totalorder %v3115_v17, 0 }
 0x137   : > { %v596_v19 = vor.u32 4788187, %v595_v16  ;;  %v599_v20 = vcvt.s32.f32 %v592_v15  ;;  %v691_v21 = vsel %vm3116_vm13, 0, %v3115_v17  ;;  %vm718_vm10 = vcmp.eq.s32.totalorder %v713_v9, 2 }
 0x138   : > { %v692_v23 = vsub.s32 32, %v691_v21  ;;  %v693_v27 = vshll.u32 %v684_v61, %v691_v21  ;;  %v696_v28 = vsub.s32 4294967266, %v691_v21  ;;  %v931_v61 = vmul.f32 %v3643_v51, %v498_v54 }
 0x139   : > { %v597_v12 = vand.u32 2147483647, %v596_v19  ;;  %vm714_vm12 = vcmp.lt.s32.totalorder %v713_v9, 2  ;;  %vm715_vm13 = vcmp.eq.s32.totalorder %v713_v9, 0 }
 0x13a   : > { %v694_v31 = vshrl.u32 %v676_v11, %v692_v23  ;;  %v697_v24 = vadd.s32 127, %v696_v28  ;;  %v963_v28 = vld [vmem:[#allocation9] sm:$0xff] }
 0x13b   : > { %v600_v25 = vmul.f32 %v599_v20, %v597_v12 }
 0x13c   : > { %v695_v35 = vor.u32 %v694_v31, %v693_v27  ;;  %v698_v36 = vshll.u32 %v697_v24, 23 }
 0x13d   : > { %v601_v32 = vxor.u32 2147483648, %v600_v25 }
 0x13e   : > { %v699_v41 = vor.u32 4788187, %v698_v36  ;;  %v702_v42 = vcvt.s32.f32 %v695_v35 }
 0x13f   : > { %v602_v37 = vsel %vm519_vm14, %v601_v32, %v600_v25  ;;  %vm923_vm14 = vcmp.eq.s32.totalorder %v921_v13, 0 }
 0x140   : > { %v605_v39 = vsel %vm518_vm15, %v4346_v4, %v602_v37  ;;  %v700_v44 = vand.u32 2147483647, %v699_v41  ;;  %v955_v4 = vld [vmem:[#allocation7] sm:$0xff]  ;;  %vm922_vm15 = vcmp.lt.s32.totalorder %v921_v13, 2 }
 0x141   : > { %3644 = vcosq.f32 %v605_v39 }
 0x142   : > { %3646 = vsinq.f32 %v605_v39  ;;  %v703_v6 = vmul.f32 %v702_v42, %v700_v44  ;;  %v4434_v44 = vld [vmem:[#allocation7 + $0x30] sm:$0xff] }
 0x143   : > { %3648 = vpow2.f32 %v513_v43  ;;  %v959_v43 = vld [vmem:[#allocation7 + $0x20] sm:$0xff] }
 0x144   : > { %v704_v3 = vxor.u32 2147483648, %v703_v6 }
 0x146   : > { %v705_v50 = vsel %vm622_vm0, %v704_v3, %v703_v6 }
 0x147   : > { %v708_v52 = vsel %vm621_vm1, %v4349_v5, %v705_v50 }
 0x148   : > { %3650 = vcosq.f32 %v708_v52 }
 0x149   : > { %3652 = vsinq.f32 %v708_v52 }
 0x14b   : > { %v3645_v53 = vpop.eup %3644 }
 0x14c   : > { %v3647_v56 = vpop.eup %3646  ;;  %v616_v58 = vxor.u32 2147483648, %v3645_v53 }
 0x14d   : > { %v613_v57 = vxor.u32 2147483648, %v3647_v56  ;;  %v3649_v0 = vpop.eup %3648 }
 0x14e   : > { %v617_v59 = vsel %vm615_vm2, %v616_v58, %v3647_v56  ;;  %v824_v60 = vsel %vm822_vm3, %v616_v58, %v3647_v56  ;;  %v932_v20 = vmul.f32 %v3649_v0, %v499_v1  ;;  %v936_v11 = vmul.f32 %v3649_v0, %v505_v2  ;;  %v956_v56 = vld [vmem:[#allocation7 + $0x8] sm:$0xff]  ;;  %v962_v2 = vld [vmem:[#allocation7 + $0x38] sm:$0xff] }
 0x14f   : > { %v614_v26 = vsel %vm612_vm4, %v3645_v53, %v613_v57  ;;  %v821_v63 = vsel %vm819_vm5, %v3645_v53, %v613_v57  ;;  %vm1035_vm2 = vcmask 130048   ;;  %v964_v58 = vld [vmem:[#allocation9 + $0x8] sm:$0xff]  ;;  %vm2874_vm5 = vcmask 261248  }
 0x150   : > { %v618_v7 = vsel %vm611_vm7, %v614_v26, %v617_v59  ;;  %v825_v10 = vsel %vm818_vm8, %v821_v63, %v824_v60  ;;  %v958_v59 = vld [vmem:[#allocation7 + $0x18] sm:$0xff]  ;;  %v968_v1 = vld [vmem:[#allocation9 + $0x28] sm:$0xff] }
 0x151   : > { %v619_v14 = vsel %vm609_vm6, nan, %v618_v7  ;;  %v826_v15 = vsel %vm609_vm6, nan, %v825_v10  ;;  %v966_v60 = vld [vmem:[#allocation9 + $0x18] sm:$0xff] }
 0x152   : > { %v933_v16 = vmul.f32 %v931_v61, %v619_v14  ;;  %v937_v17 = vmul.f32 %v935_v62, %v826_v15  ;;  %v941_v18 = vmul.f32 %v931_v61, %v826_v15  ;;  %v943_v19 = vmul.f32 %v935_v62, %v619_v14  ;;  %v3651_v12 = vpop.eup %3650  ;;  %v960_v62 = vld [vmem:[#allocation7 + $0x28] sm:$0xff]  ;;  %v970_v7 = vld [vmem:[#allocation9 + $0x38] sm:$0xff] }
 0x153   : > { %v3653_v23 = vpop.eup %3652  ;;  %v719_v27 = vxor.u32 2147483648, %v3651_v12 }
 0x154   : > { %v939_v22 = vsub.f32 %v933_v16, %v937_v17  ;;  %v945_v21 = vadd.f32 %v943_v19, %v941_v18  ;;  %v716_v29 = vxor.u32 2147483648, %v3653_v23 }
 0x155   : > { %v720_v25 = vsel %vm718_vm10, %v719_v27, %v3653_v23  ;;  %v928_v31 = vsel %vm926_vm11, %v719_v27, %v3653_v23 }
 0x156   : > { %vm947_vm0 = vcmp.ne.f32.partialorder %v939_v22, %v939_v22  ;;  %vm951_vm1 = vcmp.ne.f32.partialorder %v945_v21, %v945_v21  ;;  %v717_v35 = vsel %vm715_vm13, %v3651_v12, %v716_v29  ;;  %v925_v36 = vsel %vm923_vm14, %v3651_v12, %v716_v29 }
 0x157   : > { %v4425_v24 = vsel %vm947_vm0, 0.0, %v939_v22  ;;  %v4427_v32 = vsel %vm951_vm1, 0.0, %v945_v21  ;;  %v721_v40 = vsel %vm714_vm12, %v717_v35, %v720_v25  ;;  %v929_v41 = vsel %vm922_vm15, %v925_v36, %v928_v31 }
 0x158   : > { %v995_v37 = vmul.f32 %v963_v28, %v4425_v24  ;;  %v1003_v39 = vmul.f32 %v955_v4, %v4427_v32  ;;  %v997_v42 = vmul.f32 %v965_v30, %v4425_v24  ;;  %v722_v46 = vsel %vm712_vm9, nan, %v721_v40 }
 0x159   : > { %v930_v6 = vsel %vm712_vm9, nan, %v929_v41  ;;  %v1005_v3 = vmul.f32 %v957_v33, %v4427_v32  ;;  %v999_v47 = vmul.f32 %v967_v34, %v4425_v24  ;;  %v934_v48 = vmul.f32 %v932_v20, %v722_v46 }
 0x15a   : > { %v938_v49 = vmul.f32 %v936_v11, %v930_v6  ;;  %v942_v50 = vmul.f32 %v932_v20, %v930_v6  ;;  %v944_v51 = vmul.f32 %v936_v11, %v722_v46  ;;  %v1011_v52 = vadd.f32 %v1003_v39, %v995_v37 }
 0x15b   : > { %v1007_v38 = vmul.f32 %v959_v43, %v4427_v32  ;;  %v1001_v53 = vmul.f32 %v4436_v45, %v4425_v24  ;;  %v1009_v54 = vmul.f32 %v4434_v44, %v4427_v32  ;;  %v971_v8 = vmul.f32 %v955_v4, %v4425_v24 }
 0x15c   : > { %v940_v5 = vsub.f32 %v934_v48, %v938_v49  ;;  %v946_v55 = vadd.f32 %v944_v51, %v942_v50  ;;  %v979_v57 = vmul.f32 %v963_v28, %v4427_v32  ;;  %v1013_v61 = vadd.f32 %v1005_v3, %v997_v42 }
 0x15d   : > { %v1015_v26 = vadd.f32 %v1007_v38, %v999_v47  ;;  %v1017_v63 = vadd.f32 %v1009_v54, %v1001_v53  ;;  %v973_v0 = vmul.f32 %v957_v33, %v4425_v24  ;;  %v981_v10 = vmul.f32 %v965_v30, %v4427_v32 }
 0x15e   : > { %vm948_vm3 = vcmp.ne.f32.partialorder %v940_v5, %v940_v5  ;;  %vm952_vm4 = vcmp.ne.f32.partialorder %v946_v55, %v946_v55  ;;  %v987_v9 = vsub.f32 %v971_v8, %v979_v57  ;;  %v975_v15 = vmul.f32 %v959_v43, %v4425_v24 }
 0x15f   : > { %v950_v13 = vsel %vm948_vm3, 0.0, %v940_v5  ;;  %v954_v14 = vsel %vm952_vm4, 0.0, %v946_v55  ;;  %v983_v16 = vmul.f32 %v967_v34, %v4427_v32  ;;  %v989_v31 = vsub.f32 %v973_v0, %v981_v10 }
 0x160   : > { %v996_v17 = vmul.f32 %v964_v58, %v950_v13  ;;  %v1004_v18 = vmul.f32 %v956_v56, %v954_v14  ;;  %v998_v19 = vmul.f32 %v966_v60, %v950_v13  ;;  %v1006_v20 = vmul.f32 %v958_v59, %v954_v14 }
 0x161   : > { %v1000_v11 = vmul.f32 %v968_v1, %v950_v13  ;;  %v1008_v12 = vmul.f32 %v960_v62, %v954_v14  ;;  %v1002_v22 = vmul.f32 %v970_v7, %v950_v13  ;;  %v1010_v21 = vmul.f32 %v962_v2, %v954_v14 }
 0x162   : > { %v1012_v23 = vadd.f32 %v1004_v18, %v996_v17  ;;  %v1014_v27 = vadd.f32 %v1006_v20, %v998_v19  ;;  %v972_v4 = vmul.f32 %v956_v56, %v950_v13  ;;  %v980_v28 = vmul.f32 %v964_v58, %v954_v14 }
 0x163   : > { %v1016_v29 = vadd.f32 %v1008_v12, %v1000_v11  ;;  %v974_v30 = vmul.f32 %v958_v59, %v950_v13  ;;  %v982_v25 = vmul.f32 %v966_v60, %v954_v14  ;;  %v976_v34 = vmul.f32 %v960_v62, %v950_v13 }
 0x164   : > { %v1025_v33 = vpack.c.bf16 %v1012_v23, %v1011_v52  ;;  %v1026_v35 = vpack.c.bf16 %v1014_v27, %v1013_v61  ;;  %v988_v36 = vsub.f32 %v972_v4, %v980_v28  ;;  %v1018_v39 = vadd.f32 %v1010_v21, %v1002_v22  ;;  %v3639_v27 = vld [vmem:[#allocation13] sm:$0xff]  }
 0x165   : > { %v1027_v37 = vpack.c.bf16 %v1016_v29, %v1015_v26  ;;  %v990_v40 = vsub.f32 %v974_v30, %v982_v25  ;;  %v984_v41 = vmul.f32 %v968_v1, %v954_v14  ;;  %v991_v43 = vsub.f32 %v975_v15, %v983_v16  ;;  %3279 = vmatprep.subr.bf16.mxu1 %v3639_v27 }
 0x166   : > { %3261 = vmatprep.mubr.msk.bf16.mxu1 %vm1035_vm2, %v1025_v33  ;;  %v1021_v42 = vpack.c.bf16 %v988_v36, %v987_v9  ;;  %v977_v46 = vmul.f32 %v4434_v44, %v4425_v24  ;;  %v978_v6 = vmul.f32 %v962_v2, %v950_v13  ;;  %v985_v48 = vmul.f32 %v4436_v45, %v4427_v32 }
 0x167   : > { %3262 = vmatmul.mubr.msk.bf16.vlgmr.msra.gmra.mrb[0].mxu1 %vm1035_vm2, %v1026_v35  ;;  %v1022_v3 = vpack.c.bf16 %v990_v40, %v989_v31  ;;  %v992_v47 = vsub.f32 %v976_v34, %v984_v41  ;;  %v986_v49 = vmul.f32 %v970_v7, %v954_v14  ;;  %v1028_v38 = vpack.c.bf16 %v1018_v39, %v1017_v63 }
 0x168   : > { %3265 = vmatprep.mubr.msk.bf16.mxu1 %vm1035_vm2, %v1027_v37  ;;  %3251 = vmatprep.mubr.msk.bf16.mxu0 %vm1035_vm2, %v1021_v42  ;;  %v993_v51 = vsub.f32 %v977_v46, %v985_v48 }
 0x169   : > { %3252 = vmatmul.mubr.msk.bf16.vlgmr.msra.gmra.mrb[0].mxu0 %vm1035_vm2, %v1022_v3  ;;  %v1023_v50 = vpack.c.bf16 %v992_v47, %v991_v43  ;;  %v994_v52 = vsub.f32 %v978_v6, %v986_v49  ;;  %3269 = vmatprep.subr.bf16.mxu0 %v3639_v27 }
 0x16a   : > { %3280 = vmatpush3.bf16.msra.mxu1 %v3639_v27  ;;  %3270 = vmatpush3.bf16.msra.mxu0 %v3639_v27 }
 0x16b   : > { %3255 = vmatprep.mubr.msk.bf16.mxu0 %vm1035_vm2, %v1023_v50  ;;  %v1024_v24 = vpack.c.bf16 %v994_v52, %v993_v51  ;;  %v3206_v52 = vld [vmem:[%s4333_s22 + $0x8] sm:$0xff]  }
 0x16f   : > { %3266 = vmatmul.mubr.msk.bf16.gmra.mrb[4].mxu1 %vm1035_vm2, %v1028_v38  ;;  %v3193_v38 = vunpack.c.l.bf16 %v3206_v52 }
 0x171   : > { %3256 = vmatmul.mubr.msk.bf16.gmra.mrb[4].mxu0 %vm1035_vm2, %v1024_v24  ;;  %v3194_v24 = vunpack.c.h.bf16 %v3206_v52 }
 0x23a   : > { %v3263_v44 = vpop.f32.mrb[0].mxu1 }
 0x23b   : > { %v1159_v32 = vpop.f32.mrb[1].mxu1 }
 0x23c   : > { %1230 = vrot.lane.b32.xlu0 %v1159_v32, %s3952_s20  ;;  %v3264_v45 = vpop.f32.mrb[2].mxu1  ;;  %v4468_v53 = vpop.f32.mrb[0].mxu0 }
 0x23d   : > { %v1162_v54 = vpop.f32.mrb[3].mxu1  ;;  %v4470_v5 = vpop.f32.mrb[1].mxu0 }
 0x23e   : > { %1232 = vrot.lane.b32.xlu1 %v1162_v54, %s3952_s20  ;;  %v4473_v55 = vpop.f32.mrb[2].mxu0 }
 0x23f   : > { %v4475_v56 = vpop.f32.mrb[3].mxu0 }
 0x240   : > { %1234 = vrot.lane.b32.xlu0 %v3263_v44, %s3952_s20 }
 0x242   : > { %1236 = vrot.lane.b32.xlu1 %v3264_v45, %s3952_s20  ;;  %v3267_v58 = vpop.f32.mrb[4].mxu1 }
 0x243   : > { %v1175_v8 = vpop.f32.mrb[5].mxu1 }
 0x244   : > { %1238 = vrot.lane.b32.xlu0 %v1175_v8, %s3952_s20  ;;  %v3268_v57 = vpop.f32.mrb[6].mxu1  ;;  %v4480_v59 = vpop.f32.mrb[4].mxu0 }
 0x245   : > { %v1178_v60 = vpop.f32.mrb[7].mxu1  ;;  %v4482_v61 = vpop.f32.mrb[5].mxu0 }
 0x246   : > { %1242 = vrot.lane.b32.xlu1 %v3267_v58, %s3952_s20  ;;  %v4485_v62 = vpop.f32.mrb[6].mxu0 }
 0x247   : > { %v4487_v26 = vpop.f32.mrb[7].mxu0 }
 0x248   : > { %1240 = vrot.lane.b32.xlu0 %v1178_v60, %s3952_s20 }
 0x24a   : > { %1244 = vrot.lane.b32.xlu1 %v3268_v57, %s3952_s20 }
 0x2ae   : > { %v1231_v63 = vpop.permute.xlu0 %1230 }
 0x2af   : > { %v1254_v2 = vadd.f32 %v1231_v63, %v4470_v5 }
 0x2b0   : > { %v1233_v0 = vpop.permute.xlu1 %1232 }
 0x2b1   : > { %v1255_v10 = vadd.f32 %v1233_v0, %v4475_v56 }
 0x2b2   : > { %v1235_v1 = vpop.permute.xlu0 %1234 }
 0x2b3   : > { %v1256_v7 = vadd.f32 %v4468_v53, %v1235_v1 }
 0x2b4   : > { %v1237_v9 = vpop.permute.xlu1 %1236 }
 0x2b5   : > { %v3466_v13 = vpack.i.bf16 %v1256_v7, %v1254_v2  ;;  %v1257_v14 = vadd.f32 %v4473_v55, %v1237_v9 }
 0x2b6   : > { %v1239_v15 = vpop.permute.xlu0 %1238 }
 0x2b7   : > { %v3471_v16 = vpack.i.bf16 %v1257_v14, %v1255_v10  ;;  %3467 = vrot.lane.b32.xlu0 %v3466_v13, %s3953_s4  ;;  %v1258_v17 = vadd.f32 %v1239_v15, %v4482_v61 }
 0x2b8   : > { %v1243_v18 = vpop.permute.xlu1 %1242 }
 0x2b9   : > { %v1260_v19 = vadd.f32 %v4480_v59, %v1243_v18  ;;  %3472 = vrot.lane.b32.xlu1 %v3471_v16, %s3953_s4 }
 0x2ba   : > { %v1241_v20 = vpop.permute.xlu0 %1240 }
 0x2bb   : > { %v3476_v11 = vpack.i.bf16 %v1260_v19, %v1258_v17  ;;  %v1259_v12 = vadd.f32 %v1241_v20, %v4487_v26 }
 0x2bc   : > { %v1245_v22 = vpop.permute.xlu1 %1244 }
 0x2bd   : > { %v1261_v21 = vadd.f32 %v4485_v62, %v1245_v22  ;;  %1202 = vrot.lane.b32.xlu1 %v3263_v44, %s3953_s4  ;;  %3477 = vrot.lane.b32.xlu0 %v3476_v11, %s3953_s4  ;;  %v3547_v44 = vpack.i.bf16 %v3194_v24, %v3193_v38  ;;  %v3640_v24 = vld [vmem:[%s4991_s9] sm:$0xff]  }
 0x2be   : > { %3299 = vmatprep.subr.bf16.mxu1 %v3640_v24  ;;  %3289 = vmatprep.subr.bf16.mxu0 %v3640_v24 }
 0x2bf   : > { %v3481_v23 = vpack.i.bf16 %v1261_v21, %v1259_v12 }
 0x2c1   : > { %1204 = vrot.lane.b32.xlu1 %v3264_v45, %s3953_s4  ;;  %1198 = vrot.lane.b32.xlu0 %v1159_v32, %s3953_s4  ;;  %v4524_v32 = vld [vmem:[%s4989_s29 + $0x8] sm:$0xff]  ;;  %v3188_v45 = vld [vmem:[%s4333_s22] sm:$0xff]  }
 0x2c5   : > { %1200 = vrot.lane.b32.xlu0 %v1162_v54, %s3953_s4  ;;  %3482 = vrot.lane.b32.xlu1 %v3481_v23, %s3953_s4  ;;  %v3190_v54 = vunpack.c.h.bf16 %v3188_v45 }
 0x2c9   : > { %1206 = vrot.lane.b32.xlu1 %v1175_v8, %s3953_s4 }
 0x2cd   : > { %1210 = vrot.lane.b32.xlu1 %v3267_v58, %s3953_s4 }
 0x2d1   : > { %1208 = vrot.lane.b32.xlu1 %v1178_v60, %s3953_s4 }
 0x2d5   : > { %1212 = vrot.lane.b32.xlu1 %v3268_v57, %s3953_s4 }
 0x329   : > { %v3468_v4 = vpop.permute.xlu0 %3467 }
 0x32a   : > { %3487 = vxpose.xlu0.b32.start [1/2] (short) (narrow) %v3468_v4, 16 }
 0x32b   : > { %v3473_v28 = vpop.permute.xlu1 %3472 }
 0x32e   : > { %3489 = vxpose.xlu0.b32.end [2/2] (short) (narrow) %v3473_v28, 16 }
 0x32f   : > { %v1203_v29 = vpop.permute.xlu1 %1202  ;;  %v3478_v30 = vpop.permute.xlu0 %3477 }
 0x330   : > { %v1224_v33 = vsub.f32 %v4468_v53, %v1203_v29  ;;  %3501 = vxpose.xlu1.b32.start [1/2] (short) (narrow) %v3478_v30, 16  ;;  %v3189_v53 = vunpack.c.l.bf16 %v3188_v45 }
 0x333   : > { %v1205_v25 = vpop.permute.xlu1 %1204  ;;  %v1199_v31 = vpop.permute.xlu0 %1198 }
 0x334   : > { %v1222_v35 = vsub.f32 %v4470_v5, %v1199_v31  ;;  %v1225_v39 = vsub.f32 %v4473_v55, %v1205_v25  ;;  %v3542_v5 = vpack.i.bf16 %v3190_v54, %v3189_v53  ;;  %v4533_v55 = vld [vmem:[%s4990_s17] sm:$0xff] }
 0x336   : > { %v3514_v36 = vpack.i.bf16 %v1224_v33, %v1222_v35  ;;  %v3207_v33 = vld [vmem:[%s4333_s22 + $0x10] sm:$0xff]  }
 0x337   : > { %v1201_v34 = vpop.permute.xlu0 %1200  ;;  %v3483_v37 = vpop.permute.xlu1 %3482 }
 0x338   : > { %v1223_v40 = vsub.f32 %v4475_v56, %v1201_v34  ;;  %3515 = vxpose.xlu0.b32.start [1/2] (short) (narrow) %v3514_v36, 16  ;;  %3503 = vxpose.xlu1.b32.end [2/2] (short) (narrow) %v3483_v37, 16  ;;  %v3208_v36 = vld [vmem:[%s4333_s22 + $0x18] sm:$0xff]   ;;  %v3197_v37 = vunpack.c.l.bf16 %v3207_v33 }
 0x33a   : > { %v3516_v41 = vpack.i.bf16 %v1225_v39, %v1223_v40  ;;  %v3198_v39 = vunpack.c.h.bf16 %v3207_v33 }
 0x33b   : > { %v1207_v42 = vpop.permute.xlu1 %1206 }
 0x33c   : > { %3517 = vxpose.xlu0.b32.end [2/2] (short) (narrow) %v3516_v41, 16  ;;  %v1226_v46 = vsub.f32 %v4482_v61, %v1207_v42 }
 0x33f   : > { %v1211_v43 = vpop.permute.xlu1 %1210 }
 0x340   : > { %v1228_v6 = vsub.f32 %v4480_v59, %v1211_v43 }
 0x342   : > { %v3528_v3 = vpack.i.bf16 %v1228_v6, %v1226_v46  ;;  %v3201_v46 = vunpack.c.l.bf16 %v3208_v36  ;;  %v3202_v6 = vunpack.c.h.bf16 %v3208_v36 }
 0x343   : > { %v1209_v47 = vpop.permute.xlu1 %1208 }
 0x344   : > { %3529 = vxpose.xlu0.b32.start [1/2] (short) (narrow) %v3528_v3, 16  ;;  %v1227_v49 = vsub.f32 %v4487_v26, %v1209_v47 }
 0x347   : > { %v1213_v48 = vpop.permute.xlu1 %1212 }
 0x348   : > { %v1229_v50 = vsub.f32 %v4485_v62, %v1213_v48  ;;  %v3552_v48 = vpack.i.bf16 %v3198_v39, %v3197_v37 }
 0x34a   : > { %v3530_v51 = vpack.i.bf16 %v1229_v50, %v1227_v49  ;;  %v3557_v49 = vpack.i.bf16 %v3202_v6, %v3201_v46 }
 0x34c   : > { %3531 = vxpose.xlu0.b32.end [2/2] (short) (narrow) %v3530_v51, 16 }
 0x356   : > { %3548 = vrot.lane.b32.xlu1 %v3547_v44, %s3952_s20 }
 0x35a   : > { %1886 = vrot.lane.b32.xlu1 %v4524_v32, %s3952_s20 }
 0x375   : > { %3543 = vrot.lane.b32.xlu0 %v3542_v5, %s3952_s20 }
 0x379   : > { %1884 = vrot.lane.b32.xlu0 %v4533_v55, %s3952_s20 }
 0x3aa   : > { %v3490_v56 = vpop.trf.xlu0 }
 0x3ab   : > { %v3494_v58 = vunpack.i.h.bf16 %v3490_v56  ;;  %v3491_v8 = vunpack.i.l.bf16 %v3490_v56 }
 0x3ae   : > { %v3495_v57 = vpop.trf.xlu0 }
 0x3af   : > { %v3499_v59 = vunpack.i.h.bf16 %v3495_v57  ;;  %v3496_v60 = vunpack.i.l.bf16 %v3495_v57 }
 0x3b1   : > { %v1557_v61 = vpack.c.bf16 %v3499_v59, %v3494_v58  ;;  %v1556_v62 = vpack.c.bf16 %v3496_v60, %v3491_v8 }
 0x3b3   : > { %3281 = vmatprep.mubr.msk.bf16.mxu1 %vm1035_vm2, %v1556_v62 }
 0x3b4   : > { %3282 = vmatmul.mubr.msk.bf16.vlgmr.msra.gmra.mrb[8].mxu1 %vm1035_vm2, %v1557_v61  ;;  %v3504_v26 = vpop.trf.xlu1 }
 0x3b5   : > { %v3508_v0 = vunpack.i.h.bf16 %v3504_v26  ;;  %v3505_v1 = vunpack.i.l.bf16 %v3504_v26  ;;  %3300 = vmatpush3.bf16.msra.mxu1 %v3640_v24 }
 0x3b8   : > { %v3518_v63 = vpop.trf.xlu0  ;;  %v3509_v2 = vpop.trf.xlu1 }
 0x3b9   : > { %v3522_v7 = vunpack.i.h.bf16 %v3518_v63  ;;  %v3519_v9 = vunpack.i.l.bf16 %v3518_v63  ;;  %v3513_v13 = vunpack.i.h.bf16 %v3509_v2  ;;  %v3510_v14 = vunpack.i.l.bf16 %v3509_v2 }
 0x3bb   : > { %v1558_v17 = vpack.c.bf16 %v3510_v14, %v3505_v1  ;;  %v1559_v18 = vpack.c.bf16 %v3513_v13, %v3508_v0 }
 0x3bc   : > { %v3523_v10 = vpop.trf.xlu0 }
 0x3bd   : > { %v3527_v15 = vunpack.i.h.bf16 %v3523_v10  ;;  %v3524_v16 = vunpack.i.l.bf16 %v3523_v10  ;;  %3285 = vmatprep.mubr.msk.bf16.mxu1 %vm1035_vm2, %v1558_v17 }
 0x3be   : > { %3286 = vmatmul.mubr.msk.bf16.gmra.mrb[12].mxu1 %vm1035_vm2, %v1559_v18 }
 0x3bf   : > { %v1553_v19 = vpack.c.bf16 %v3527_v15, %v3522_v7  ;;  %v1552_v20 = vpack.c.bf16 %v3524_v16, %v3519_v9 }
 0x3c1   : > { %3271 = vmatprep.mubr.msk.bf16.mxu0 %vm1035_vm2, %v1552_v20 }
 0x3c2   : > { %3272 = vmatmul.mubr.msk.bf16.vlgmr.msra.gmra.mrb[8].mxu0 %vm1035_vm2, %v1553_v19 }
 0x3c3   : > { %3290 = vmatpush3.bf16.msra.mxu0 %v3640_v24 }
 0x3c8   : > { %v3532_v11 = vpop.trf.xlu0  ;;  %v3549_v45 = vpop.permute.xlu1 %3548 }
 0x3c9   : > { %v3536_v12 = vunpack.i.h.bf16 %v3532_v11  ;;  %v3533_v22 = vunpack.i.l.bf16 %v3532_v11  ;;  %v3550_v56 = vunpack.i.l.bf16 %v3549_v45  ;;  %v3551_v57 = vunpack.i.h.bf16 %v3549_v45 }
 0x3cc   : > { %v3537_v21 = vpop.trf.xlu0  ;;  %v1887_v54 = vpop.permute.xlu1 %1886 }
 0x3cd   : > { %v3541_v23 = vunpack.i.h.bf16 %v3537_v21  ;;  %v3538_v27 = vunpack.i.l.bf16 %v3537_v21 }
 0x3cf   : > { %v1554_v4 = vpack.c.bf16 %v3538_v27, %v3533_v22  ;;  %v1555_v28 = vpack.c.bf16 %v3541_v23, %v3536_v12 }
 0x3d1   : > { %3275 = vmatprep.mubr.msk.bf16.mxu0 %vm1035_vm2, %v1554_v4 }
 0x3d2   : > { %3276 = vmatmul.mubr.msk.bf16.gmra.mrb[12].mxu0 %vm1035_vm2, %v1555_v28 }
 0x3e7   : > { %v3544_v44 = vpop.permute.xlu0 %3543 }
 0x3e8   : > { %v3545_v62 = vunpack.i.l.bf16 %v3544_v44  ;;  %v3546_v0 = vunpack.i.h.bf16 %v3544_v44 }
 0x3eb   : > { %v1885_v53 = vpop.permute.xlu0 %1884 }
 0x487   : > { %v4545_v29 = vpop.f32.mrb[8].mxu1 }
 0x488   : > { %v4547_v30 = vpop.f32.mrb[9].mxu1  ;;  %1764 = vrot.lane.b32.xlu0 %v4545_v29, %s3952_s20 }
 0x489   : > { %v4551_v25 = vpop.f32.mrb[10].mxu1 }
 0x48a   : > { %v4553_v31 = vpop.f32.mrb[11].mxu1  ;;  %1766 = vrot.lane.b32.xlu1 %v4551_v25, %s3952_s20 }
 0x48c   : > { %1760 = vrot.lane.b32.xlu0 %v4547_v30, %s3952_s20 }
 0x48e   : > { %1762 = vrot.lane.b32.xlu1 %v4553_v31, %s3952_s20 }
 0x491   : > { %v4562_v35 = vpop.f32.mrb[12].mxu1 }
 0x492   : > { %1772 = vrot.lane.b32.xlu0 %v4562_v35, %s3952_s20  ;;  %v4567_v34 = vpop.f32.mrb[13].mxu1 }
 0x493   : > { %v4571_v41 = vpop.f32.mrb[14].mxu1 }
 0x494   : > { %1774 = vrot.lane.b32.xlu1 %v4571_v41, %s3952_s20  ;;  %v4577_v43 = vpop.f32.mrb[15].mxu1 }
 0x495   : > { %v4569_v40 = vpop.f32.mrb[8].mxu0 }
 0x496   : > { %v4573_v42 = vpop.f32.mrb[9].mxu0  ;;  %1768 = vrot.lane.b32.xlu0 %v4567_v34, %s3952_s20 }
 0x497   : > { %v4579_v3 = vpop.f32.mrb[10].mxu0 }
 0x498   : > { %v4581_v47 = vpop.f32.mrb[11].mxu0  ;;  %1770 = vrot.lane.b32.xlu1 %v4577_v43, %s3952_s20 }
 0x49a   : > { %3553 = vrot.lane.b32.xlu0 %v3552_v48, %s3952_s20 }
 0x49c   : > { %3558 = vrot.lane.b32.xlu1 %v3557_v49, %s3952_s20 }
 0x4a5   : > { %v4589_v50 = vpop.f32.mrb[12].mxu0 }
 0x4a6   : > { %v4591_v51 = vpop.f32.mrb[13].mxu0 }
 0x4a7   : > { %v4593_v52 = vpop.f32.mrb[14].mxu0 }
 0x4a8   : > { %v4595_v38 = vpop.f32.mrb[15].mxu0 }
 0x4fa   : > { %v1765_v5 = vpop.permute.xlu0 %1764 }
 0x4fb   : > { %v1786_v58 = vadd.f32 %v4569_v40, %v1765_v5 }
 0x4fc   : > { %v1767_v8 = vpop.permute.xlu1 %1766 }
 0x4fd   : > { %v1876_v59 = vsub.f32 %v1786_v58, %v3550_v56  ;;  %v1787_v60 = vadd.f32 %v4579_v3, %v1767_v8 }
 0x4fe   : > { %v1761_v61 = vpop.permute.xlu0 %1760 }
 0x4ff   : > { %v1877_v26 = vsub.f32 %v1787_v60, %v3551_v57  ;;  %v1784_v63 = vadd.f32 %v1761_v61, %v4573_v42  ;;  %v1892_v2 = vmul.f32 %v1885_v53, %v1876_v59  ;;  %v3204_v60 = vld [vmem:[%s4326_s30 + $0x10] sm:$0xff]  }
 0x500   : > { %v1763_v1 = vpop.permute.xlu1 %1762 }
 0x501   : > { %v1893_v7 = vmul.f32 %v1887_v54, %v1877_v26  ;;  %v1874_v9 = vsub.f32 %v1784_v63, %v3545_v62  ;;  %v1785_v10 = vadd.f32 %v1763_v1, %v4581_v47  ;;  %v3181_v1 = vunpack.c.l.bf16 %v3204_v60 }
 0x503   : > { %v1875_v13 = vsub.f32 %v1785_v10, %v3546_v0  ;;  %v1905_v14 = vpack.c.bf16 %v1893_v7, %v1892_v2  ;;  %v1890_v16 = vmul.f32 %v1885_v53, %v1874_v9  ;;  %v3205_v10 = vld [vmem:[%s4326_s30 + $0x18] sm:$0xff]  }
 0x504   : > { %v1773_v15 = vpop.permute.xlu0 %1772 }
 0x505   : > { %v1891_v17 = vmul.f32 %v1887_v54, %v1875_v13  ;;  %1997 = vrot.lane.b32.xlu1 %v1905_v14, %s3953_s4  ;;  %v1790_v4 = vadd.f32 %v4589_v50, %v1773_v15 }
 0x506   : > { %v1775_v18 = vpop.permute.xlu1 %1774 }
 0x507   : > { %v1904_v19 = vpack.c.bf16 %v1891_v17, %v1890_v16  ;;  %v1791_v28 = vadd.f32 %v4593_v52, %v1775_v18  ;;  %v3182_v16 = vunpack.c.h.bf16 %v3204_v60  ;;  %v3185_v18 = vunpack.c.l.bf16 %v3205_v10 }
 0x508   : > { %v1769_v20 = vpop.permute.xlu0 %1768 }
 0x509   : > { %1995 = vrot.lane.b32.xlu0 %v1904_v19, %s3953_s4  ;;  %v1788_v22 = vadd.f32 %v1769_v20, %v4591_v51 }
 0x50a   : > { %v1771_v11 = vpop.permute.xlu1 %1770 }
 0x50b   : > { %v1789_v21 = vadd.f32 %v1771_v11, %v4595_v38 }
 0x50c   : > { %v3554_v12 = vpop.permute.xlu0 %3553 }
 0x50d   : > { %v3556_v23 = vunpack.i.h.bf16 %v3554_v12  ;;  %v3555_v27 = vunpack.i.l.bf16 %v3554_v12 }
 0x50e   : > { %v3559_v33 = vpop.permute.xlu1 %3558 }
 0x50f   : > { %v1878_v36 = vsub.f32 %v1788_v22, %v3555_v27  ;;  %v1879_v37 = vsub.f32 %v1789_v21, %v3556_v23  ;;  %v3561_v39 = vunpack.i.h.bf16 %v3559_v33  ;;  %v3560_v46 = vunpack.i.l.bf16 %v3559_v33 }
 0x510   : > { %v3186_v23 = vunpack.c.h.bf16 %v3205_v10 }
 0x511   : > { %v1894_v6 = vmul.f32 %v1885_v53, %v1878_v36  ;;  %v1895_v48 = vmul.f32 %v1887_v54, %v1879_v37  ;;  %v1881_v49 = vsub.f32 %v1791_v28, %v3561_v39  ;;  %v1880_v24 = vsub.f32 %v1790_v4, %v3560_v46 }
 0x513   : > { %v1897_v44 = vmul.f32 %v1887_v54, %v1881_v49  ;;  %v1896_v45 = vmul.f32 %v1885_v53, %v1880_v24  ;;  %v1906_v5 = vpack.c.bf16 %v1895_v48, %v1894_v6 }
 0x515   : > { %1999 = vrot.lane.b32.xlu0 %v1906_v5, %s3953_s4  ;;  %v1907_v56 = vpack.c.bf16 %v1897_v44, %v1896_v45 }
 0x517   : > { %2001 = vrot.lane.b32.xlu1 %v1907_v56, %s3953_s4 }
 0x519   : > { %1728 = vrot.lane.b32.xlu0 %v4547_v30, %s3953_s4 }
 0x51b   : > { %1730 = vrot.lane.b32.xlu1 %v4553_v31, %s3953_s4 }
 0x51d   : > { %1732 = vrot.lane.b32.xlu0 %v4545_v29, %s3953_s4 }
 0x51f   : > { %1734 = vrot.lane.b32.xlu1 %v4551_v25, %s3953_s4  ;;  %v3172_v25 = vld [vmem:[%s4326_s30] sm:$0xff]  }
 0x521   : > { %1736 = vrot.lane.b32.xlu0 %v4567_v34, %s3953_s4 }
 0x523   : > { %1738 = vrot.lane.b32.xlu1 %v4577_v43, %s3953_s4  ;;  %v3173_v43 = vunpack.c.l.bf16 %v3172_v25 }
 0x525   : > { %1740 = vrot.lane.b32.xlu0 %v4562_v35, %s3953_s4  ;;  %v3203_v35 = vld [vmem:[%s4326_s30 + $0x8] sm:$0xff]  }
 0x526   : > { %v3177_v59 = vunpack.c.l.bf16 %v3203_v35  ;;  %v3178_v63 = vunpack.c.h.bf16 %v3203_v35 }
 0x527   : > { %1742 = vrot.lane.b32.xlu1 %v4571_v41, %s3953_s4  ;;  %v3174_v41 = vunpack.c.h.bf16 %v3172_v25 }
 0x577   : > { %v1998_v31 = vpop.permute.xlu1 %1997 }
 0x57b   : > { %v1996_v30 = vpop.permute.xlu0 %1995 }
 0x57c   : > { %3301 = vmatprep.mubr.msk.bf16.mxu1 %vm1035_vm2, %v1996_v30 }
 0x57d   : > { %3302 = vmatmul.mubr.msk.bf16.vlgmr.msra.gmra.mrb[16].mxu1 %vm1035_vm2, %v1998_v31 }
 0x587   : > { %v2000_v29 = vpop.permute.xlu0 %1999 }
 0x588   : > { %3305 = vmatprep.mubr.msk.bf16.mxu1 %vm1035_vm2, %v2000_v29 }
 0x589   : > { %v2002_v34 = vpop.permute.xlu1 %2001 }
 0x58a   : > { %3306 = vmatmul.mubr.msk.bf16.gmra.mrb[20].mxu1 %vm1035_vm2, %v2002_v34 }
 0x58b   : > { %v1729_v53 = vpop.permute.xlu0 %1728 }
 0x58c   : > { %v1752_v54 = vsub.f32 %v4573_v42, %v1729_v53 }
 0x58d   : > { %v1731_v58 = vpop.permute.xlu1 %1730 }
 0x58e   : > { %v1810_v8 = vsub.f32 %v1752_v54, %v3173_v43  ;;  %v1753_v57 = vsub.f32 %v4581_v47, %v1731_v58 }
 0x58f   : > { %v1733_v61 = vpop.permute.xlu0 %1732 }
 0x590   : > { %v1811_v62 = vsub.f32 %v1753_v57, %v3174_v41  ;;  %v1754_v26 = vsub.f32 %v4569_v40, %v1733_v61  ;;  %v1818_v2 = vmul.f32 %v1810_v8, %v4533_v55 }
 0x591   : > { %v1735_v0 = vpop.permute.xlu1 %1734 }
 0x592   : > { %v1819_v7 = vmul.f32 %v1811_v62, %v4524_v32  ;;  %v1812_v42 = vsub.f32 %v1754_v26, %v3177_v59  ;;  %v1755_v9 = vsub.f32 %v4579_v3, %v1735_v0 }
 0x593   : > { %v1737_v13 = vpop.permute.xlu0 %1736 }
 0x594   : > { %v1900_v14 = vpack.c.bf16 %v1819_v7, %v1818_v2  ;;  %v1813_v47 = vsub.f32 %v1755_v9, %v3178_v63  ;;  %v1756_v15 = vsub.f32 %v4591_v51, %v1737_v13  ;;  %v1820_v40 = vmul.f32 %v1812_v42, %v4533_v55  ;;  %v3641_v9 = vld [vmem:[#allocation15] sm:$0xff]  }
 0x595   : > { %v1739_v17 = vpop.permute.xlu1 %1738  ;;  %3319 = vmatprep.subr.bf16.mxu1 %v3641_v9  ;;  %3309 = vmatprep.subr.bf16.mxu0 %v3641_v9 }
 0x596   : > { %v1821_v19 = vmul.f32 %v1813_v47, %v4524_v32  ;;  %v1814_v20 = vsub.f32 %v1756_v15, %v3181_v1  ;;  %v1757_v11 = vsub.f32 %v4595_v38, %v1739_v17  ;;  %3291 = vmatprep.mubr.msk.bf16.mxu0 %vm1035_vm2, %v1900_v14  ;;  %3320 = vmatpush3.bf16.msra.mxu1 %v3641_v9 }
 0x597   : > { %v1741_v12 = vpop.permute.xlu0 %1740 }
 0x598   : > { %v1901_v3 = vpack.c.bf16 %v1821_v19, %v1820_v40  ;;  %v1815_v22 = vsub.f32 %v1757_v11, %v3182_v16  ;;  %v1758_v21 = vsub.f32 %v4589_v50, %v1741_v12  ;;  %v1822_v51 = vmul.f32 %v1814_v20, %v4533_v55 }
 0x599   : > { %v1743_v27 = vpop.permute.xlu1 %1742 }
 0x59a   : > { %v1823_v4 = vmul.f32 %v1815_v22, %v4524_v32  ;;  %v1816_v28 = vsub.f32 %v1758_v21, %v3185_v18  ;;  %v1759_v33 = vsub.f32 %v4593_v52, %v1743_v27  ;;  %3292 = vmatmul.mubr.msk.bf16.vlgmr.msra.gmra.mrb[16].mxu0 %vm1035_vm2, %v1901_v3 }
 0x59b   : > { %3310 = vmatpush3.bf16.msra.mxu0 %v3641_v9 }
 0x59c   : > { %v1902_v36 = vpack.c.bf16 %v1823_v4, %v1822_v51  ;;  %v1817_v38 = vsub.f32 %v1759_v33, %v3186_v23  ;;  %v1824_v37 = vmul.f32 %v1816_v28, %v4533_v55 }
 0x59e   : > { %v1825_v39 = vmul.f32 %v1817_v38, %v4524_v32  ;;  %3295 = vmatprep.mubr.msk.bf16.mxu0 %vm1035_vm2, %v1902_v36 }
 0x5a0   : > { %v1903_v50 = vpack.c.bf16 %v1825_v39, %v1824_v37 }
 0x5a2   : > { %3296 = vmatmul.mubr.msk.bf16.gmra.mrb[20].mxu0 %vm1035_vm2, %v1903_v50 }
 0x650   : > { %v3303_v46 = vpop.f32.mrb[16].mxu1 }
 0x651   : > { %v2049_v6 = vpop.f32.mrb[17].mxu1  ;;  %2124 = vrot.lane.b32.xlu1 %v3303_v46, %s3952_s20 }
 0x652   : > { %2120 = vrot.lane.b32.xlu0 %v2049_v6, %s3952_s20  ;;  %v3304_v52 = vpop.f32.mrb[18].mxu1 }
 0x653   : > { %v2052_v48 = vpop.f32.mrb[19].mxu1 }
 0x655   : > { %2126 = vrot.lane.b32.xlu1 %v3304_v52, %s3952_s20 }
 0x656   : > { %2122 = vrot.lane.b32.xlu0 %v2052_v48, %s3952_s20 }
 0x65d   : > { %v3307_v55 = vpop.f32.mrb[20].mxu1 }
 0x65e   : > { %2132 = vrot.lane.b32.xlu1 %v3307_v55, %s3952_s20  ;;  %v2065_v32 = vpop.f32.mrb[21].mxu1 }
 0x65f   : > { %2128 = vrot.lane.b32.xlu0 %v2065_v32, %s3952_s20  ;;  %v3308_v49 = vpop.f32.mrb[22].mxu1 }
 0x660   : > { %v2068_v24 = vpop.f32.mrb[23].mxu1 }
 0x662   : > { %2134 = vrot.lane.b32.xlu1 %v3308_v49, %s3952_s20 }
 0x663   : > { %2130 = vrot.lane.b32.xlu0 %v2068_v24, %s3952_s20 }
 0x66d   : > { %v3293_v44 = vpop.f32.mrb[16].mxu0 }
 0x66e   : > { %v1960_v45 = vpop.f32.mrb[17].mxu0 }
 0x66f   : > { %v4664_v5 = vpop.f32.mrb[18].mxu0 }
 0x670   : > { %v1963_v56 = vpop.f32.mrb[19].mxu0 }
 0x675   : > { %v4666_v30 = vpop.f32.mrb[20].mxu0 }
 0x676   : > { %v4668_v31 = vpop.f32.mrb[21].mxu0 }
 0x677   : > { %v4670_v29 = vpop.f32.mrb[22].mxu0 }
 0x678   : > { %v4672_v25 = vpop.f32.mrb[23].mxu0 }
 0x6c3   : > { %v2125_v34 = vpop.permute.xlu1 %2124 }
 0x6c4   : > { %v2146_v43 = vadd.f32 %v3293_v44, %v2125_v34  ;;  %v2121_v53 = vpop.permute.xlu0 %2120 }
 0x6c5   : > { %v2144_v35 = vadd.f32 %v2121_v53, %v1960_v45 }
 0x6c7   : > { %v3562_v54 = vpack.i.bf16 %v2146_v43, %v2144_v35  ;;  %v2127_v41 = vpop.permute.xlu1 %2126 }
 0x6c8   : > { %v2147_v58 = vadd.f32 %v4664_v5, %v2127_v41  ;;  %v2123_v8 = vpop.permute.xlu0 %2122 }
 0x6c9   : > { %v2145_v57 = vadd.f32 %v2123_v8, %v1963_v56  ;;  %3563 = vrot.lane.b32.xlu0 %v3562_v54, %s3953_s4 }
 0x6cb   : > { %v3567_v59 = vpack.i.bf16 %v2147_v58, %v2145_v57 }
 0x6cd   : > { %3568 = vrot.lane.b32.xlu1 %v3567_v59, %s3953_s4 }
 0x6d0   : > { %v2133_v60 = vpop.permute.xlu1 %2132 }
 0x6d1   : > { %v2150_v61 = vadd.f32 %v4666_v30, %v2133_v60  ;;  %v2129_v62 = vpop.permute.xlu0 %2128  ;;  %2092 = vrot.lane.b32.xlu1 %v3303_v46, %s3953_s4 }
 0x6d2   : > { %v2148_v26 = vadd.f32 %v2129_v62, %v4668_v31 }
 0x6d4   : > { %v3572_v63 = vpack.i.bf16 %v2150_v61, %v2148_v26  ;;  %v2135_v0 = vpop.permute.xlu1 %2134 }
 0x6d5   : > { %v2151_v1 = vadd.f32 %v4670_v29, %v2135_v0  ;;  %v2131_v2 = vpop.permute.xlu0 %2130  ;;  %2094 = vrot.lane.b32.xlu1 %v3304_v52, %s3953_s4 }
 0x6d6   : > { %v2149_v7 = vadd.f32 %v2131_v2, %v4672_v25  ;;  %3573 = vrot.lane.b32.xlu0 %v3572_v63, %s3953_s4 }
 0x6d8   : > { %v3577_v42 = vpack.i.bf16 %v2151_v1, %v2149_v7 }
 0x6da   : > { %2088 = vrot.lane.b32.xlu0 %v2049_v6, %s3953_s4  ;;  %3578 = vrot.lane.b32.xlu1 %v3577_v42, %s3953_s4 }
 0x6de   : > { %2090 = vrot.lane.b32.xlu0 %v2052_v48, %s3953_s4  ;;  %2096 = vrot.lane.b32.xlu1 %v2065_v32, %s3953_s4 }
 0x6e2   : > { %2100 = vrot.lane.b32.xlu1 %v3307_v55, %s3953_s4 }
 0x6e6   : > { %2098 = vrot.lane.b32.xlu1 %v2068_v24, %s3953_s4 }
 0x6ea   : > { %2102 = vrot.lane.b32.xlu1 %v3308_v49, %s3953_s4 }
 0x73b   : > { %v3564_v10 = vpop.permute.xlu0 %3563 }
 0x73c   : > { %3583 = vxpose.xlu0.b32.start [1/2] (short) (narrow) %v3564_v10, 16 }
 0x73f   : > { %v3569_v13 = vpop.permute.xlu1 %3568 }
 0x740   : > { %3585 = vxpose.xlu0.b32.end [2/2] (short) (narrow) %v3569_v13, 16 }
 0x743   : > { %v2093_v14 = vpop.permute.xlu1 %2092 }
 0x744   : > { %v2114_v18 = vsub.f32 %v3293_v44, %v2093_v14 }
 0x747   : > { %v2095_v47 = vpop.permute.xlu1 %2094 }
 0x748   : > { %v3574_v15 = vpop.permute.xlu0 %3573  ;;  %v2115_v12 = vsub.f32 %v4664_v5, %v2095_v47 }
 0x749   : > { %3597 = vxpose.xlu1.b32.start [1/2] (short) (narrow) %v3574_v15, 16 }
 0x74c   : > { %v2089_v16 = vpop.permute.xlu0 %2088  ;;  %v3579_v17 = vpop.permute.xlu1 %3578 }
 0x74d   : > { %v2112_v40 = vsub.f32 %v1960_v45, %v2089_v16  ;;  %3599 = vxpose.xlu1.b32.end [2/2] (short) (narrow) %v3579_v17, 16 }
 0x74f   : > { %v3610_v19 = vpack.i.bf16 %v2114_v18, %v2112_v40  ;;  %v3654_v18 = vld [vmem:[#allocation9 + $0x8] sm:$0xff] }
 0x750   : > { %v2091_v20 = vpop.permute.xlu0 %2090  ;;  %v2097_v11 = vpop.permute.xlu1 %2096 }
 0x751   : > { %v2113_v3 = vsub.f32 %v1963_v56, %v2091_v20  ;;  %3611 = vxpose.xlu0.b32.start [1/2] (short) (narrow) %v3610_v19, 16  ;;  %v2116_v23 = vsub.f32 %v4668_v31, %v2097_v11  ;;  %v3655_v19 = vld [vmem:[#allocation9] sm:$0xff]  ;;  %v3656_v20 = vld [vmem:[#allocation9 + $0x18] sm:$0xff]  ;;  %v3657_v11 = vld [vmem:[#allocation9 + $0x10] sm:$0xff] }
 0x753   : > { %v3612_v22 = vpack.i.bf16 %v2115_v12, %v2113_v3  ;;  %v4737_v12 = vld [vmem:[#allocation7 + $0x8] sm:$0xff]  ;;  %v4741_v3 = vld [vmem:[#allocation7] sm:$0xff] }
 0x754   : > { %v2101_v21 = vpop.permute.xlu1 %2100 }
 0x755   : > { %v2118_v27 = vsub.f32 %v4666_v30, %v2101_v21  ;;  %3613 = vxpose.xlu0.b32.end [2/2] (short) (narrow) %v3612_v22, 16  ;;  %v4745_v22 = vld [vmem:[#allocation7 + $0x18] sm:$0xff]  ;;  %v4749_v21 = vld [vmem:[#allocation7 + $0x10] sm:$0xff] }
 0x757   : > { %v3624_v51 = vpack.i.bf16 %v2118_v27, %v2116_v23  ;;  %v3662_v23 = vld [vmem:[#allocation9 + $0x28] sm:$0xff]  ;;  %v3663_v27 = vld [vmem:[#allocation9 + $0x20] sm:$0xff] }
 0x758   : > { %v2099_v4 = vpop.permute.xlu1 %2098 }
 0x759   : > { %3625 = vxpose.xlu0.b32.start [1/2] (short) (narrow) %v3624_v51, 16  ;;  %v2117_v33 = vsub.f32 %v4672_v25, %v2099_v4  ;;  %v4757_v51 = vld [vmem:[#allocation7 + $0x28] sm:$0xff]  ;;  %v4761_v4 = vld [vmem:[#allocation7 + $0x20] sm:$0xff] }
 0x75c   : > { %v2103_v28 = vpop.permute.xlu1 %2102 }
 0x75d   : > { %v2119_v36 = vsub.f32 %v4670_v29, %v2103_v28  ;;  %v3666_v28 = vld [vmem:[#allocation9 + $0x38] sm:$0xff] }
 0x75f   : > { %v3626_v38 = vpack.i.bf16 %v2119_v36, %v2117_v33  ;;  %v3667_v33 = vld [vmem:[#allocation9 + $0x30] sm:$0xff]  ;;  %v4767_v36 = vld [vmem:[#allocation7 + $0x38] sm:$0xff] }
 0x761   : > { %3627 = vxpose.xlu0.b32.end [2/2] (short) (narrow) %v3626_v38, 16  ;;  %v4771_v38 = vld [vmem:[#allocation7 + $0x30] sm:$0xff] }
 0x7bc   : > { %v3586_v37 = vpop.trf.xlu0 }
 0x7bd   : > { %v3590_v39 = vunpack.i.h.bf16 %v3586_v37  ;;  %v3587_v50 = vunpack.i.l.bf16 %v3586_v37 }
 0x7c0   : > { %v3591_v46 = vpop.trf.xlu0 }
 0x7c1   : > { %v3595_v6 = vunpack.i.h.bf16 %v3591_v46  ;;  %v3592_v52 = vunpack.i.l.bf16 %v3591_v46 }
 0x7c3   : > { %v2447_v48 = vpack.c.bf16 %v3595_v6, %v3590_v39  ;;  %v2446_v55 = vpack.c.bf16 %v3592_v52, %v3587_v50 }
 0x7c5   : > { %3321 = vmatprep.mubr.msk.bf16.mxu1 %vm1035_vm2, %v2446_v55 }
 0x7c6   : > { %3322 = vmatmul.mubr.msk.bf16.vlgmr.msra.gmra.mrb[24].mxu1 %vm1035_vm2, %v2447_v48 }
 0x7c9   : > { %v3600_v32 = vpop.trf.xlu1 }
 0x7ca   : > { %v3604_v49 = vunpack.i.h.bf16 %v3600_v32  ;;  %v3601_v24 = vunpack.i.l.bf16 %v3600_v32 }
 0x7cd   : > { %v3605_v44 = vpop.trf.xlu1 }
 0x7ce   : > { %v3609_v5 = vunpack.i.h.bf16 %v3605_v44  ;;  %v3606_v56 = vunpack.i.l.bf16 %v3605_v44 }
 0x7d0   : > { %v2448_v30 = vpack.c.bf16 %v3606_v56, %v3601_v24  ;;  %v2449_v31 = vpack.c.bf16 %v3609_v5, %v3604_v49 }
 0x7d1   : > { %v3614_v45 = vpop.trf.xlu0 }
 0x7d2   : > { %v3618_v29 = vunpack.i.h.bf16 %v3614_v45  ;;  %v3615_v25 = vunpack.i.l.bf16 %v3614_v45  ;;  %3325 = vmatprep.mubr.msk.bf16.mxu1 %vm1035_vm2, %v2448_v30 }
 0x7d3   : > { %3326 = vmatmul.mubr.msk.bf16.gmra.mrb[28].mxu1 %vm1035_vm2, %v2449_v31 }
 0x7d5   : > { %v3619_v34 = vpop.trf.xlu0 }
 0x7d6   : > { %v3623_v43 = vunpack.i.h.bf16 %v3619_v34  ;;  %v3620_v53 = vunpack.i.l.bf16 %v3619_v34 }
 0x7d8   : > { %v2443_v35 = vpack.c.bf16 %v3623_v43, %v3618_v29  ;;  %v2442_v54 = vpack.c.bf16 %v3620_v53, %v3615_v25 }
 0x7da   : > { %3311 = vmatprep.mubr.msk.bf16.mxu0 %vm1035_vm2, %v2442_v54 }
 0x7db   : > { %3312 = vmatmul.mubr.msk.bf16.vlgmr.msra.gmra.mrb[24].mxu0 %vm1035_vm2, %v2443_v35 }
 0x7dd   : > { %v3628_v41 = vpop.trf.xlu0 }
 0x7de   : > { %v3632_v58 = vunpack.i.h.bf16 %v3628_v41  ;;  %v3629_v8 = vunpack.i.l.bf16 %v3628_v41 }
 0x7e1   : > { %v3633_v57 = vpop.trf.xlu0 }
 0x7e2   : > { %v3637_v59 = vunpack.i.h.bf16 %v3633_v57  ;;  %v3634_v60 = vunpack.i.l.bf16 %v3633_v57 }
 0x7e4   : > { %v2444_v61 = vpack.c.bf16 %v3634_v60, %v3629_v8  ;;  %v2445_v62 = vpack.c.bf16 %v3637_v59, %v3632_v58 }
 0x7e6   : > { %3315 = vmatprep.mubr.msk.bf16.mxu0 %vm1035_vm2, %v2444_v61 }
 0x7e7   : > { %3316 = vmatmul.mubr.msk.bf16.gmra.mrb[28].mxu0 %vm1035_vm2, %v2445_v62 }
 0x899   : > { %v3323_v26 = vpop.f32.mrb[24].mxu1 }
 0x89a   : > { %2622 = vrot.lane.b32.xlu0 %v3323_v26, %s3953_s4  ;;  %v2579_v63 = vpop.f32.mrb[25].mxu1 }
 0x89b   : > { %v3324_v0 = vpop.f32.mrb[26].mxu1 }
 0x89c   : > { %2624 = vrot.lane.b32.xlu1 %v3324_v0, %s3953_s4  ;;  %v2582_v1 = vpop.f32.mrb[27].mxu1 }
 0x89e   : > { %2618 = vrot.lane.b32.xlu0 %v2579_v63, %s3953_s4 }
 0x8a0   : > { %2620 = vrot.lane.b32.xlu1 %v2582_v1, %s3953_s4 }
 0x8a6   : > { %v3327_v2 = vpop.f32.mrb[28].mxu1 }
 0x8a7   : > { %2630 = vrot.lane.b32.xlu0 %v3327_v2, %s3953_s4  ;;  %v2595_v7 = vpop.f32.mrb[29].mxu1 }
 0x8a8   : > { %v3328_v42 = vpop.f32.mrb[30].mxu1 }
 0x8a9   : > { %2632 = vrot.lane.b32.xlu1 %v3328_v42, %s3953_s4  ;;  %v2598_v9 = vpop.f32.mrb[31].mxu1 }
 0x8ab   : > { %2626 = vrot.lane.b32.xlu0 %v2595_v7, %s3953_s4 }
 0x8ad   : > { %2628 = vrot.lane.b32.xlu1 %v2598_v9, %s3953_s4 }
 0x8ae   : > { %v4710_v10 = vpop.f32.mrb[24].mxu0 }
 0x8af   : > { %v4713_v13 = vpop.f32.mrb[25].mxu0  ;;  %2650 = vrot.lane.b32.xlu0 %v2579_v63, %s3952_s20 }
 0x8b0   : > { %v4715_v14 = vpop.f32.mrb[26].mxu0 }
 0x8b1   : > { %v4718_v47 = vpop.f32.mrb[27].mxu0  ;;  %2652 = vrot.lane.b32.xlu1 %v2582_v1, %s3952_s20 }
 0x8b3   : > { %2654 = vrot.lane.b32.xlu0 %v3323_v26, %s3952_s20 }
 0x8b5   : > { %2656 = vrot.lane.b32.xlu1 %v3324_v0, %s3952_s20 }
 0x8b7   : > { %2658 = vrot.lane.b32.xlu0 %v2595_v7, %s3952_s20 }
 0x8b9   : > { %2700 = vrot.lane.b32.xlu1 %v3654_v18, %s3952_s20 }
 0x8ba   : > { %v4724_v15 = vpop.f32.mrb[28].mxu0 }
 0x8bb   : > { %v4727_v16 = vpop.f32.mrb[29].mxu0  ;;  %2698 = vrot.lane.b32.xlu0 %v3655_v19, %s3952_s20 }
 0x8bc   : > { %v4729_v17 = vpop.f32.mrb[30].mxu0 }
 0x8bd   : > { %v4732_v40 = vpop.f32.mrb[31].mxu0  ;;  %2704 = vrot.lane.b32.xlu1 %v3656_v20, %s3952_s20 }
 0x8bf   : > { %2702 = vrot.lane.b32.xlu0 %v3657_v11, %s3952_s20 }
 0x8c1   : > { %2796 = vrot.lane.b32.xlu1 %v4737_v12, %s3952_s20 }
 0x8c3   : > { %2794 = vrot.lane.b32.xlu0 %v4741_v3, %s3952_s20 }
 0x8c5   : > { %2800 = vrot.lane.b32.xlu1 %v4745_v22, %s3952_s20 }
 0x8c7   : > { %2798 = vrot.lane.b32.xlu0 %v4749_v21, %s3952_s20 }
 0x8c9   : > { %2664 = vrot.lane.b32.xlu1 %v3328_v42, %s3952_s20 }
 0x8cb   : > { %2662 = vrot.lane.b32.xlu0 %v3327_v2, %s3952_s20 }
 0x8cd   : > { %2708 = vrot.lane.b32.xlu1 %v3662_v23, %s3952_s20 }
 0x8cf   : > { %2706 = vrot.lane.b32.xlu0 %v3663_v27, %s3952_s20 }
 0x8d1   : > { %2804 = vrot.lane.b32.xlu1 %v4757_v51, %s3952_s20 }
 0x8d3   : > { %2802 = vrot.lane.b32.xlu0 %v4761_v4, %s3952_s20 }
 0x8d5   : > { %2712 = vrot.lane.b32.xlu1 %v3666_v28, %s3952_s20 }
 0x8d7   : > { %2710 = vrot.lane.b32.xlu0 %v3667_v33, %s3952_s20 }
 0x8d9   : > { %2808 = vrot.lane.b32.xlu1 %v4767_v36, %s3952_s20 }
 0x8db   : > { %2806 = vrot.lane.b32.xlu0 %v4771_v38, %s3952_s20 }
 0x8dd   : > { %2660 = vrot.lane.b32.xlu1 %v2598_v9, %s3952_s20 }
 0x90c   : > { %v2623_v37 = vpop.permute.xlu0 %2622 }
 0x90d   : > { %v4777_v39 = vsub.f32 %v4710_v10, %v2623_v37 }
 0x90e   : > { %v2625_v50 = vpop.permute.xlu1 %2624 }
 0x90f   : > { %v2828_v46 = vmul.f32 %v3657_v11, %v4777_v39  ;;  %v4781_v6 = vsub.f32 %v4715_v14, %v2625_v50 }
 0x910   : > { %v2619_v52 = vpop.permute.xlu0 %2618 }
 0x911   : > { %v2829_v48 = vmul.f32 %v3656_v20, %v4781_v6  ;;  %v4785_v55 = vsub.f32 %v4713_v13, %v2619_v52  ;;  %2846 = vrot.lane.b32.xlu0 %v2828_v46, %s3952_s20 }
 0x912   : > { %v2621_v32 = vpop.permute.xlu1 %2620 }
 0x913   : > { %v2826_v49 = vmul.f32 %v3655_v19, %v4785_v55  ;;  %v4790_v24 = vsub.f32 %v4718_v47, %v2621_v32  ;;  %2848 = vrot.lane.b32.xlu1 %v2829_v48, %s3952_s20 }
 0x915   : > { %v2827_v44 = vmul.f32 %v3654_v18, %v4790_v24  ;;  %2842 = vrot.lane.b32.xlu0 %v2826_v49, %s3952_s20 }
 0x917   : > { %2844 = vrot.lane.b32.xlu1 %v2827_v44, %s3952_s20 }
 0x919   : > { %v2631_v45 = vpop.permute.xlu0 %2630 }
 0x91a   : > { %v4800_v29 = vsub.f32 %v4724_v15, %v2631_v45 }
 0x91b   : > { %v2633_v5 = vpop.permute.xlu1 %2632 }
 0x91c   : > { %v4807_v53 = vsub.f32 %v4729_v17, %v2633_v5  ;;  %v2832_v41 = vmul.f32 %v3667_v33, %v4800_v29 }
 0x91d   : > { %v2627_v56 = vpop.permute.xlu0 %2626 }
 0x91e   : > { %v4797_v30 = vsub.f32 %v4727_v16, %v2627_v56  ;;  %v2833_v8 = vmul.f32 %v3666_v28, %v4807_v53 }
 0x91f   : > { %v2629_v31 = vpop.permute.xlu1 %2628 }
 0x920   : > { %v2830_v25 = vmul.f32 %v3663_v27, %v4797_v30  ;;  %v4804_v34 = vsub.f32 %v4732_v40, %v2629_v31 }
 0x921   : > { %v2651_v43 = vpop.permute.xlu0 %2650 }
 0x922   : > { %v2831_v35 = vmul.f32 %v3662_v23, %v4804_v34  ;;  %2850 = vrot.lane.b32.xlu0 %v2830_v25, %s3952_s20  ;;  %v2674_v62 = vadd.f32 %v2651_v43, %v4713_v13 }
 0x923   : > { %v2653_v54 = vpop.permute.xlu1 %2652 }
 0x924   : > { %2852 = vrot.lane.b32.xlu1 %v2831_v35, %s3952_s20  ;;  %v2675_v60 = vadd.f32 %v2653_v54, %v4718_v47 }
 0x925   : > { %v2655_v58 = vpop.permute.xlu0 %2654 }
 0x926   : > { %2854 = vrot.lane.b32.xlu0 %v2832_v41, %s3952_s20  ;;  %v2676_v7 = vadd.f32 %v4710_v10, %v2655_v58 }
 0x927   : > { %v2657_v57 = vpop.permute.xlu1 %2656 }
 0x928   : > { %2856 = vrot.lane.b32.xlu1 %v2833_v8, %s3952_s20  ;;  %v2677_v0 = vadd.f32 %v4715_v14, %v2657_v57 }
 0x929   : > { %v2659_v59 = vpop.permute.xlu0 %2658 }
 0x92a   : > { %v2678_v37 = vadd.f32 %v2659_v59, %v4727_v16 }
 0x92b   : > { %v2701_v61 = vpop.permute.xlu1 %2700 }
 0x92c   : > { %v2723_v26 = vmul.f32 %v2701_v61, %v2675_v60 }
 0x92d   : > { %v2699_v63 = vpop.permute.xlu0 %2698 }
 0x92e   : > { %v2722_v1 = vmul.f32 %v2699_v63, %v2674_v62  ;;  %2740 = vrot.lane.b32.xlu1 %v2723_v26, %s3953_s4 }
 0x92f   : > { %v2705_v2 = vpop.permute.xlu1 %2704 }
 0x930   : > { %v2725_v42 = vmul.f32 %v2705_v2, %v2677_v0  ;;  %2738 = vrot.lane.b32.xlu0 %v2722_v1, %s3953_s4 }
 0x931   : > { %v2703_v9 = vpop.permute.xlu0 %2702 }
 0x932   : > { %v2724_v18 = vmul.f32 %v2703_v9, %v2676_v7  ;;  %2744 = vrot.lane.b32.xlu1 %v2725_v42, %s3953_s4 }
 0x933   : > { %v2797_v47 = vpop.permute.xlu1 %2796 }
 0x934   : > { %v2819_v19 = vmul.f32 %v2797_v47, %v2675_v60  ;;  %2742 = vrot.lane.b32.xlu0 %v2724_v18, %s3953_s4 }
 0x935   : > { %v2795_v13 = vpop.permute.xlu0 %2794 }
 0x936   : > { %v2818_v20 = vmul.f32 %v2795_v13, %v2674_v62 }
 0x937   : > { %v2801_v14 = vpop.permute.xlu1 %2800 }
 0x938   : > { %v2821_v11 = vmul.f32 %v2801_v14, %v2677_v0 }
 0x939   : > { %v2799_v23 = vpop.permute.xlu0 %2798 }
 0x93a   : > { %v2820_v27 = vmul.f32 %v2799_v23, %v2676_v7 }
 0x93b   : > { %v2665_v28 = vpop.permute.xlu1 %2664 }
 0x93c   : > { %v2681_v5 = vadd.f32 %v4729_v17, %v2665_v28 }
 0x93d   : > { %v2663_v33 = vpop.permute.xlu0 %2662 }
 0x93e   : > { %v2680_v44 = vadd.f32 %v4724_v15, %v2663_v33 }
 0x93f   : > { %v2709_v10 = vpop.permute.xlu1 %2708 }
 0x941   : > { %v2707_v50 = vpop.permute.xlu0 %2706 }
 0x942   : > { %v2726_v46 = vmul.f32 %v2707_v50, %v2678_v37 }
 0x943   : > { %v2805_v52 = vpop.permute.xlu1 %2804 }
 0x944   : > { %2746 = vrot.lane.b32.xlu0 %v2726_v46, %s3953_s4 }
 0x945   : > { %v2803_v48 = vpop.permute.xlu0 %2802 }
 0x946   : > { %v2822_v32 = vmul.f32 %v2803_v48, %v2678_v37 }
 0x947   : > { %v2713_v49 = vpop.permute.xlu1 %2712 }
 0x948   : > { %v2729_v41 = vmul.f32 %v2713_v49, %v2681_v5  ;;  %v2682_v49 = vmul.f32 %v4741_v3, %v4785_v55 }
 0x949   : > { %v2711_v45 = vpop.permute.xlu0 %2710 }
 0x94a   : > { %v2728_v56 = vmul.f32 %v2711_v45, %v2680_v44 }
 0x94b   : > { %v2809_v31 = vpop.permute.xlu1 %2808 }
 0x94c   : > { %v2825_v25 = vmul.f32 %v2809_v31, %v2681_v5  ;;  %2750 = vrot.lane.b32.xlu0 %v2728_v56, %s3953_s4  ;;  %v2684_v31 = vmul.f32 %v4749_v21, %v4777_v39 }
 0x94d   : > { %v2807_v58 = vpop.permute.xlu0 %2806 }
 0x94e   : > { %v2824_v18 = vmul.f32 %v2807_v58, %v2680_v44  ;;  %v2685_v44 = vmul.f32 %v4745_v22, %v4781_v6  ;;  %v2686_v22 = vmul.f32 %v4761_v4, %v4797_v30  ;;  %v2687_v4 = vmul.f32 %v4757_v51, %v4804_v34 }
 0x94f   : > { %v2661_v43 = vpop.permute.xlu1 %2660 }
 0x950   : > { %v2679_v16 = vadd.f32 %v2661_v43, %v4732_v40 }
 0x952   : > { %v2727_v35 = vmul.f32 %v2709_v10, %v2679_v16  ;;  %v2823_v54 = vmul.f32 %v2805_v52, %v2679_v16  ;;  %v2683_v52 = vmul.f32 %v4737_v12, %v4790_v24 }
 0x954   : > { %2748 = vrot.lane.b32.xlu1 %v2727_v35, %s3953_s4 }
 0x958   : > { %2752 = vrot.lane.b32.xlu1 %v2729_v41, %s3953_s4  ;;  %v2688_v41 = vmul.f32 %v4771_v38, %v4800_v29 }
 0x983   : > { %v2847_v15 = vpop.permute.xlu0 %2846 }
 0x984   : > { %v2868_v57 = vsub.f32 %v2820_v27, %v2847_v15 }
 0x985   : > { %v2849_v8 = vpop.permute.xlu1 %2848 }
 0x986   : > { %v2869_v59 = vsub.f32 %v2821_v11, %v2849_v8  ;;  %v2876_v62 = vsel %vm2874_vm5, %v2868_v57, 0.0 }
 0x987   : > { %v2843_v17 = vpop.permute.xlu0 %2842 }
 0x988   : > { %v2866_v60 = vsub.f32 %v2818_v20, %v2843_v17  ;;  %v2883_v0 = vsel %vm2874_vm5, %v2869_v59, 0.0 }
 0x989   : > { %v2845_v61 = vpop.permute.xlu1 %2844 }
 0x98a   : > { %v2875_v40 = vsel %vm2874_vm5, %v2866_v60, 0.0  ;;  %v2867_v26 = vsub.f32 %v2819_v19, %v2845_v61  ;;  %v2689_v60 = vmul.f32 %v4767_v36, %v4807_v53 }
 0x98b   : > { %v2877_v63 = vadd.f32 %v2876_v62, %v2875_v40 }
 0x98c   : > { %v2882_v1 = vsel %vm2874_vm5, %v2867_v26, 0.0 }
 0x98d   : > { %v2884_v2 = vadd.f32 %v2883_v0, %v2882_v1 }
 0x994   : > { %v2851_v7 = vpop.permute.xlu0 %2850 }
 0x995   : > { %v2870_v42 = vsub.f32 %v2822_v32, %v2851_v7 }
 0x996   : > { %v2853_v9 = vpop.permute.xlu1 %2852 }
 0x997   : > { %v2878_v47 = vsel %vm2874_vm5, %v2870_v42, 0.0  ;;  %v2871_v13 = vsub.f32 %v2823_v54, %v2853_v9 }
 0x998   : > { %v2879_v20 = vadd.f32 %v2878_v47, %v2877_v63  ;;  %v2855_v14 = vpop.permute.xlu0 %2854 }
 0x999   : > { %v2885_v11 = vsel %vm2874_vm5, %v2871_v13, 0.0  ;;  %v2872_v23 = vsub.f32 %v2824_v18, %v2855_v14 }
 0x99a   : > { %v2886_v27 = vadd.f32 %v2885_v11, %v2884_v2  ;;  %v2857_v19 = vpop.permute.xlu1 %2856 }
 0x99b   : > { %v2880_v28 = vsel %vm2874_vm5, %v2872_v23, 0.0  ;;  %v2873_v33 = vsub.f32 %v2825_v25, %v2857_v19 }
 0x99c   : > { %v2881_v10 = vadd.f32 %v2880_v28, %v2879_v20 }
 0x99d   : > { %v2887_v37 = vsel %vm2874_vm5, %v2873_v33, 0.0 }
 0x99e   : > { %v2888_v50 = vadd.f32 %v2887_v37, %v2886_v27  ;;  %2891 = vrot.lane.b32.xlu0 %v2881_v10, %s3953_s4 }
 0x9a0   : > { %2893 = vrot.lane.b32.xlu1 %v2888_v50, %s3953_s4  ;;  %v2741_v46 = vpop.permute.xlu1 %2740 }
 0x9a1   : > { %v2763_v32 = vadd.f32 %v2741_v46, %v2683_v52 }
 0x9a2   : > { %v2739_v48 = vpop.permute.xlu0 %2738 }
 0x9a3   : > { %v2762_v5 = vadd.f32 %v2739_v48, %v2682_v49  ;;  %v2777_v43 = vsel %vm1035_vm2, %v2763_v32, 0.0 }
 0x9a4   : > { %v2745_v45 = vpop.permute.xlu1 %2744 }
 0x9a5   : > { %v2765_v56 = vadd.f32 %v2745_v45, %v2685_v44  ;;  %v2770_v35 = vsel %vm1035_vm2, %v2762_v5, 0.0 }
 0x9a6   : > { %v2743_v25 = vpop.permute.xlu0 %2742 }
 0x9a7   : > { %v2778_v16 = vsel %vm1035_vm2, %v2765_v56, 0.0  ;;  %v2764_v12 = vadd.f32 %v2743_v25, %v2684_v31 }
 0x9a8   : > { %v2779_v24 = vadd.f32 %v2778_v16, %v2777_v43 }
 0x9a9   : > { %v2771_v3 = vsel %vm1035_vm2, %v2764_v12, 0.0 }
 0x9aa   : > { %v2772_v55 = vadd.f32 %v2771_v3, %v2770_v35 }
 0x9b6   : > { %v2747_v6 = vpop.permute.xlu0 %2746 }
 0x9b7   : > { %v2766_v54 = vadd.f32 %v2747_v6, %v2686_v22 }
 0x9b9   : > { %v2773_v21 = vsel %vm1035_vm2, %v2766_v54, 0.0 }
 0x9ba   : > { %v2774_v39 = vadd.f32 %v2773_v21, %v2772_v55 }
 0x9be   : > { %v2751_v58 = vpop.permute.xlu0 %2750 }
 0x9bf   : > { %v2768_v15 = vadd.f32 %v2751_v58, %v2688_v41 }
 0x9c1   : > { %v2775_v8 = vsel %vm1035_vm2, %v2768_v15, 0.0 }
 0x9c2   : > { %v2776_v57 = vadd.f32 %v2775_v8, %v2774_v39 }
 0x9c4   : > { %2784 = vst.msk [vmem:[%s492_s24] sm:$0xff] %vm1035_vm2, %v2776_v57 }
 0x9c6   : > { %v2749_v30 = vpop.permute.xlu1 %2748 }
 0x9c7   : > { %v2767_v17 = vadd.f32 %v2749_v30, %v2687_v4 }
 0x9c9   : > { %v2780_v59 = vsel %vm1035_vm2, %v2767_v17, 0.0 }
 0x9ca   : > { %v2781_v38 = vadd.f32 %v2780_v59, %v2779_v24  ;;  %v2753_v29 = vpop.permute.xlu1 %2752 }
 0x9cb   : > { %v2769_v61 = vadd.f32 %v2753_v29, %v2689_v60 }
 0x9cd   : > { %v2782_v62 = vsel %vm1035_vm2, %v2769_v61, 0.0 }
 0x9ce   : > { %v2783_v40 = vadd.f32 %v2782_v62, %v2781_v38 }
 0x9d0   : > { %2785 = vst.msk [vmem:[%s492_s24 + $0x8] sm:$0xff] %vm1035_vm2, %v2783_v40 }
 0xa10   : > { %v2892_v26 = vpop.permute.xlu0 %2891 }
 0xa11   : > { %3161 = vst.msk [vmem:[%s492_s24 + $0x10] sm:$0xff] %vm1035_vm2, %v2892_v26 }
 0xa12   : > { %v2894_v63 = vpop.permute.xlu1 %2893 }
 0xa13   : > { %3162 = vst.msk [vmem:[%s492_s24 + $0x18] sm:$0xff] %vm1035_vm2, %v2894_v63 }
 0xa14   : > { %s4992_s26 = sld [smem:[#allocation30_spill]]  ;;  %s3170_s12 = sshll.u32 %s4054_s0, 8 }
 0xa15   : > { %s2930_s11 = sshll.u32 %s492_s24, 4  ;;  %s4993_s25 = sld [smem:[#allocation38_spill]]  ;;  %s2931_s11 = int_to_ptr.vmem [resolvable:$true] %s2930_s11 }
 0xa16   : > { %s3954_s27 = smov 256   ;;  %s3955_s2 = smov 1024  }
 0xa17   : > { %s3956_s18 = smov 2   ;;  %s3957_s8 = smov 128  }
 0xa18   : > { %s3958_s0 = smov 8   ;;  %s3959_s16 = smov [#allocation17]  }
 0xa19   : > { %s3960_s20 = smov 0  }
 0xa1a   : > { %p4994_p2 = scmp.ne.s32.totalorder %s4992_s26, 0 }
 0xa1b   : > { %s2913_s15 = scalar_lea.hbm %s4993_s25, %s3170_s12 }
 0xa1c   : > { %3361 = sst [smem:[#allocation18]] (%p4994_p2), %s3954_s27 }
 0xa1d   : > { %3362 = sst [smem:[#allocation18 + $0x1]] (%p4994_p2), %s3955_s2 }
 0xa1e   : > { %3363 = sst [smem:[#allocation18 + $0x2]] (%p4994_p2), %s3956_s18 }
 0xa1f   : > { %3364 = sst [smem:[#allocation18 + $0x3]] (%p4994_p2), %s3957_s8 }
 0xa20   : > { %3365 = sst [smem:[#allocation18 + $0x4]] (%p4994_p2), %s3957_s8 }
 0xa21   : > { %3366 = sst [smem:[#allocation18 + $0x5]] (%p4994_p2), %s3958_s0 }
 0xa22   : > { %3367 = dma.general (%p4994_p2), %s2931_s11, 512, %s2913_s15, %s2901_s14, %s3959_s16, [#allocation18], %s3960_s20, 0  }
 0xa23 PF: > { %s4995_s4 = sld [smem:[#allocation27_spill]]  ;;  %s4996_s13 = sld [smem:[#allocation25_spill]] }
 0xa24   : > { %s4997_s23 = sld [smem:[#allocation31_spill]] }
 0xa29   : > { %p3407_p10 = scmp.ge.s32.totalorder %s4995_s4, 2  ;;  %s2958_s29 = sand.u32 1, %s4996_s13  }
 0xa2a   : > { %p4998_p4 = scmp.ne.s32.totalorder %s4997_s23, 0  ;;  %s2959_s21 = scalar_lea.sflag [#allocation6], %s2958_s29 }
 0xa2c   : > { %p3393_p0 = pnand %p3407_p10, %p4998_p4 }
 0xa2e   : > { %3915 = dma.done.wait (!%p3393_p0), %s2959_s21, 512  }
 0xa2f   : > { %3917 = vsyncadd (!%p3393_p0), %s2959_s21, 4294966784  ;;  %s4999_s30 = sld [smem:[#allocation28_spill]]  ;;  %s5000_s6 = sld [smem:[#allocation26_spill]] }
 0xa30   : > { %s5001_s29 = sld [smem:[#allocation29_spill]]  ;;  %s5002_s27 = smov %s3924_s28 }
 0xa35   : > { %p31_p7 = scmp.ge.s32.totalorder %s4999_s30, 6   ;;  %s5003_s28 = smov %s5000_s6 }
 0xa37   :  { %33 = sbr.rel (!%p31_p7) target bundleno = 22 (0x16), region = 146 }
 0xa3e   :  { %2964 = vsyncpa [#allocation5], 1 }
 0xa3f   :  { %2966 = vsyncpa [#allocation5 + $0x1], 1 }
 0xa40   :  { %2967 = vsyncpa [#allocation8], 1 }
 0xa41   :  { %2968 = vsyncpa [#allocation11], 1 }
 0xa42   :  { %2970 = vsyncpa [#allocation11 + $0x1], 1 }
 0xa43   :  { %2971 = vsyncpa [#allocation14], 1 }
 0xa44   :  { %2972 = vsyncpa [#allocation6], 1 }
 0xa45   :  { %2974 = vsyncpa [#allocation6 + $0x1], 1 }

</bundles_post_ra>
